<compile_context>
chip_gen: v7x
topology: tpu7x:2x2x1
jax: 0.10.0
libtpu: 0.0.40
codegen_flags: <defaults>
</compile_context>

<pallas_src>
import jax
import jax.numpy as jnp
from jax import lax
from jax.experimental import pallas as pl
from jax.experimental.pallas import tpu as pltpu


# ---------------------------------------------------------------------------
# helpers (wrapper-side, tiny)
# ---------------------------------------------------------------------------
def _round_up(x, m):
    return ((x + m - 1) // m) * m


def _compute_src_coords(proj_mat, depth_values):
    """Pixel-space sampling coords for homo_warping (pad=0).

    proj_mat: (B, 3, 4) = [R | T]; depth_values: (B, D, H, W) per-pixel depths.
    Returns xz, yz, in_mask, each (B, D, H*W), flat pixel index p = h*W + w.
    """
    B, D, H, W = depth_values.shape
    R = proj_mat[:, :, :3]
    T = proj_mat[:, :, 3:]
    ys, xs = jnp.meshgrid(jnp.arange(H, dtype=jnp.float32),
                          jnp.arange(W, dtype=jnp.float32), indexing="ij")
    grid = jnp.stack([xs.ravel(), ys.ravel(),
                      jnp.ones((H * W,), jnp.float32)], axis=0)        # (3, HW)
    pts = jnp.einsum("bij,jp->bip", R, grid)                           # (B, 3, HW)
    dv = depth_values.reshape(B, D, H * W)
    src = pts[:, :, None, :] + T[:, :, :, None] / dv[:, None, :, :]    # (B, 3, D, HW)
    xz = src[:, 0] / src[:, 2]
    yz = src[:, 1] / src[:, 2]
    xn = xz / ((W - 1) / 2.0) - 1.0
    yn = yz / ((H - 1) / 2.0) - 1.0
    mask = ((xn > -1.0) & (xn < 1.0) & (yn > -1.0) & (yn < 1.0)).astype(jnp.float32)
    return xz, yz, mask


# ---------------------------------------------------------------------------
# Kernel 1: FUSED homography warp (bilinear grid_sample as tent-weight matmul)
# + variance cost volume.  The warped volume stays in registers/VMEM.
# ---------------------------------------------------------------------------
def warp_variance_pallas(ref_flat, src_flat, xz5, yz5, in_masks, W):
    """ref_flat (B,C,HW) f32; src_flat (Vs,B,C,HW) f32; xz5/yz5 (Vs,B,D,1,HW)
    pixel-space coords; in_masks (B,D,1,HW) >= 1.  Returns (B,D,C,HW) f32."""
    Vs, B, C, HW = src_flat.shape
    D = xz5.shape[2]

    def kernel(x_ref, y_ref, r_ref, s_ref, m_ref, o_ref):
        # input-pixel integer coordinates as a column vector (HW_in, 1)
        qi = lax.broadcasted_iota(jnp.int32, (HW, 1), 0).astype(jnp.float32)
        qy = jnp.floor(qi / W)                              # input-pixel row
        qx = qi - qy * W                                    # input-pixel col
        ref = r_ref[0]                                      # (C, HW)
        vsum = ref
        vsq = ref * ref
        for v in range(Vs):                                 # static small unroll
            xp = x_ref[v, 0, 0]                             # (1, HW_out)
            yp = y_ref[v, 0, 0]
            # tent weights: out-of-range samples get weight 0 (== zeros padding)
            wx = jnp.maximum(1.0 - jnp.abs(xp - qx), 0.0)   # (HW_in, HW_out)
            wy = jnp.maximum(1.0 - jnp.abs(yp - qy), 0.0)
            warped = jnp.dot(s_ref[v, 0], wx * wy,
                             preferred_element_type=jnp.float32)   # (C, HW)
            vsum = vsum + warped
            vsq = vsq + warped * warped
        cnt = 1.0 / m_ref[0, 0]                             # (1, HW)
        mean = vsum * cnt
        o_ref[0, 0] = vsq * cnt - mean * mean

    return pl.pallas_call(
        kernel,
        out_shape=jax.ShapeDtypeStruct((B, D, C, HW), jnp.float32),
        grid_spec=pltpu.PrefetchScalarGridSpec(
            num_scalar_prefetch=0,
            grid=(B, D),
            in_specs=[
                pl.BlockSpec((Vs, 1, 1, 1, HW), lambda b, d: (0, b, d, 0, 0)),
                pl.BlockSpec((Vs, 1, 1, 1, HW), lambda b, d: (0, b, d, 0, 0)),
                pl.BlockSpec((1, C, HW), lambda b, d: (b, 0, 0)),
                pl.BlockSpec((Vs, 1, C, HW), lambda b, d: (0, b, 0, 0)),
                pl.BlockSpec((1, 1, 1, HW), lambda b, d: (b, d, 0, 0)),
            ],
            out_specs=pl.BlockSpec((1, 1, C, HW), lambda b, d: (b, d, 0, 0)),
        ),
        compiler_params=pltpu.CompilerParams(
            dimension_semantics=("parallel", "parallel"),
            vmem_limit_bytes=48 * 1024 * 1024),
    )(xz5, yz5, ref_flat, src_flat, in_masks)


# ---------------------------------------------------------------------------
# Kernel 2: ConvBnReLU (3x3, pad 1, bias=False, BN training batch stats) + 1x1
# conv head.  Single K=9*Cin im2col matmul, bf16 MXU operands / f32 acc,
# lane-dense outputs, per-step partial BN stats (grid stays "parallel").
# ---------------------------------------------------------------------------
def conv_bn_relu_proj_pallas(x_nhwc, w_oihw, gamma, beta, w_proj, eps=1e-5):
    """x_nhwc (N,H,W,Cin) f32; w_oihw (Cmid,Cin,3,3) -> cost (N,1,H*W) f32."""
    N, H, W, Cin = x_nhwc.shape
    Cmid = w_oihw.shape[0]
    HW = H * W
    WC = W * Cmid

    # bf16 operands for the MXU; padded width rounded up to a sublane multiple;
    # weight pre-reshaped so the kernel does a single K=9*Cin matmul.
    Wp = _round_up(W + 2, 8)
    xp = jnp.pad(x_nhwc, ((0, 0), (1, 1), (1, Wp - W - 1), (0, 0))).astype(jnp.bfloat16)
    w_mat = jnp.transpose(w_oihw, (2, 3, 1, 0)).reshape(9 * Cin, Cmid).astype(jnp.bfloat16)

    NB = 8 if N % 8 == 0 else (4 if N % 4 == 0 else 1)     # images per grid step
    G = N // NB

    def conv_kernel(x_ref, w_ref, y_ref, s_ref):
        x = x_ref[...].astype(jnp.float32)                 # (NB, H+2, Wp, Cin)
        taps = [x[:, kh:kh + H, kw:kw + W, :]
                for kh in range(3) for kw in range(3)]
        patches = jnp.concatenate(taps, axis=-1)           # (NB, H, W, 9*Cin)
        patches = patches.reshape(NB * HW, 9 * Cin).astype(jnp.bfloat16)
        acc = jnp.dot(patches, w_ref[...],
                      preferred_element_type=jnp.float32)  # one K=9*Cin matmul
        y_ref[...] = acc.reshape(NB, H, WC).astype(y_ref.dtype)   # lane-dense bf16
        psum = jnp.sum(acc, axis=0).reshape(1, Cmid)
        psq = jnp.sum(acc * acc, axis=0).reshape(1, Cmid)
        s_ref[0] = jnp.concatenate([psum, psq], axis=0)    # per-step partial stats

    y, stats = pl.pallas_call(
        conv_kernel,
        out_shape=(jax.ShapeDtypeStruct((N, H, WC), jnp.bfloat16),
                   jax.ShapeDtypeStruct((G, 2, Cmid), jnp.float32)),
        grid_spec=pltpu.PrefetchScalarGridSpec(
            num_scalar_prefetch=0,
            grid=(G,),
            in_specs=[
                pl.BlockSpec((NB, H + 2, Wp, Cin), lambda g: (g, 0, 0, 0)),
                pl.BlockSpec((9 * Cin, Cmid), lambda g: (0, 0)),
            ],
            out_specs=(
                pl.BlockSpec((NB, H, WC), lambda g: (g, 0, 0)),
                pl.BlockSpec((1, 2, Cmid), lambda g: (g, 0, 0)),
            ),
        ),
        compiler_params=pltpu.CompilerParams(
            dimension_semantics=("parallel",),
            vmem_limit_bytes=48 * 1024 * 1024),
    )(xp, w_mat)

    # BatchNorm training-mode batch stats (biased variance), folded to scale/shift.
    cnt = float(N * H * W)
    mean = jnp.sum(stats[:, 0, :], axis=0) / cnt
    var = jnp.maximum(jnp.sum(stats[:, 1, :], axis=0) / cnt - mean * mean, 0.0)
    scale = gamma / jnp.sqrt(var + eps)
    shift = beta - mean * scale
    scale_t = jnp.tile(scale, W).reshape(1, WC)
    shift_t = jnp.tile(shift, W).reshape(1, WC)
    proj_t = jnp.tile(w_proj, W).reshape(1, WC)

    def bn_relu_proj_kernel(y_ref, sc_ref, sh_ref, pj_ref, o_ref):
        yb = y_ref[...].astype(jnp.float32)                # (NB, H, W*Cmid)
        z = jnp.maximum(yb * sc_ref[...] + sh_ref[...], 0.0)
        t = (z * pj_ref[...]).reshape(NB, HW, Cmid)
        o_ref[...] = jnp.sum(t, axis=-1).reshape(NB, 1, HW)

    cost = pl.pallas_call(
        bn_relu_proj_kernel,
        out_shape=jax.ShapeDtypeStruct((N, 1, HW), jnp.float32),
        grid_spec=pltpu.PrefetchScalarGridSpec(
            num_scalar_prefetch=0,
            grid=(G,),
            in_specs=[
                pl.BlockSpec((NB, H, WC), lambda g: (g, 0, 0)),
                pl.BlockSpec((1, WC), lambda g: (0, 0)),
                pl.BlockSpec((1, WC), lambda g: (0, 0)),
                pl.BlockSpec((1, WC), lambda g: (0, 0)),
            ],
            out_specs=pl.BlockSpec((NB, 1, HW), lambda g: (g, 0, 0)),
        ),
        compiler_params=pltpu.CompilerParams(dimension_semantics=("parallel",)),
    )(y, scale_t, shift_t, proj_t)
    return cost


def make_cost_regularization(w_oihw, gamma, beta, w_proj, H, W):
    """Pallas stand-in for the external `cost_regularization` module.

    Accepts the internal (B, D, C, H*W) volume layout and returns
    (None, cost_reg) with cost_reg of shape (B, D, H*W) (channel dim squeezed).
    """
    def apply(volume_feat):
        B, D, C, HW = volume_feat.shape
        x = volume_feat.reshape(B, D, C, H, W)
        x = jnp.transpose(x, (0, 1, 3, 4, 2)).reshape(B * D, H, W, C)
        cost = conv_bn_relu_proj_pallas(x, w_oihw, gamma, beta, w_proj)
        return None, cost.reshape(B, D, HW)
    return apply


# ---------------------------------------------------------------------------
# Kernel 3: softmax over D fused with depth regression.
# ---------------------------------------------------------------------------
def softmax_depth_pallas(cost, depth_values_flat):
    """cost, depth_values_flat: (B, D, H*W) -> depth (B, H*W)."""
    B, D, HW = cost.shape

    def kernel(c_ref, d_ref, o_ref):
        c = c_ref[0]                                       # (D, HW)
        m = jnp.max(c, axis=0, keepdims=True)
        e = jnp.exp(c - m)
        p = e / jnp.sum(e, axis=0, keepdims=True)
        o_ref[0] = jnp.sum(p * d_ref[0], axis=0, keepdims=True)

    out = pl.pallas_call(
        kernel,
        out_shape=jax.ShapeDtypeStruct((B, 1, HW), jnp.float32),
        grid_spec=pltpu.PrefetchScalarGridSpec(
            num_scalar_prefetch=0,
            grid=(B,),
            in_specs=[
                pl.BlockSpec((1, D, HW), lambda b: (b, 0, 0)),
                pl.BlockSpec((1, D, HW), lambda b: (b, 0, 0)),
            ],
            out_specs=pl.BlockSpec((1, 1, HW), lambda b: (b, 0, 0)),
        ),
        compiler_params=pltpu.CompilerParams(dimension_semantics=("parallel",)),
    )(cost, depth_values_flat)
    return out[:, 0, :]


# ---------------------------------------------------------------------------
# DepthNet.forward
# ---------------------------------------------------------------------------
def depth_net_forward(features, proj_matrices, depth_values, num_depth,
                      cost_regularization, pad=0, prob_volume_init=None):
    assert depth_values.shape[1] == num_depth
    assert pad == 0  # TODO(synk): pad>0 halo path of homo_warping not implemented.
    V = len(features)
    B, C, H, W = features[0].shape
    D = num_depth
    HW = H * W

    ref_flat = features[0].reshape(B, C, HW).astype(jnp.float32)
    src_flat = jnp.stack([f.reshape(B, C, HW) for f in features[1:]],
                         axis=0).astype(jnp.float32)          # (V-1, B, C, HW)

    xz_l, yz_l = [], []
    mask_total = jnp.ones((B, D, HW), jnp.float32)             # ref view counts as 1
    for v in range(1, V):
        xz, yz, mask = _compute_src_coords(proj_matrices[:, v], depth_values)
        xz_l.append(xz)
        yz_l.append(yz)
        mask_total = mask_total + mask
    xz_all = jnp.stack(xz_l, axis=0).reshape(V - 1, B, D, 1, HW)
    yz_all = jnp.stack(yz_l, axis=0).reshape(V - 1, B, D, 1, HW)
    in_masks = mask_total.reshape(B, D, 1, HW)

    volume_feat = warp_variance_pallas(ref_flat, src_flat, xz_all, yz_all,
                                       in_masks, W)            # (B, D, C, HW)

    _, cost_reg = cost_regularization(volume_feat)             # (B, D, HW)
    if prob_volume_init is not None:
        cost_reg = cost_reg + prob_volume_init.reshape(B, D, HW)

    depth = softmax_depth_pallas(cost_reg, depth_values.reshape(B, D, HW))
    return {"depth": depth.reshape(B, H, W)}


# ---------------------------------------------------------------------------
# Pure-JAX reference (f32, gather-based grid_sample) for verification.
# ---------------------------------------------------------------------------
def _grid_sample_ref(feat, xz, yz):
    B, C, H, W = feat.shape
    D, HW = xz.shape[1], xz.shape[2]
    fflat = feat.reshape(B, C, H * W)
    x0 = jnp.floor(xz)
    y0 = jnp.floor(yz)
    fx = xz - x0
    fy = yz - y0

    def corner(xi, yi, wgt):
        valid = ((xi >= 0) & (xi <= W - 1) & (yi >= 0) & (yi <= H - 1)).astype(jnp.float32)
        xc = jnp.clip(xi, 0, W - 1).astype(jnp.int32)
        yc = jnp.clip(yi, 0, H - 1).astype(jnp.int32)
        idx = (yc * W + xc).reshape(B, D * HW)
        g = jax.vmap(lambda f, i: jnp.take(f, i, axis=1))(fflat, idx)
        return g.reshape(B, C, D, HW) * (valid * wgt).reshape(B, 1, D, HW)

    return (corner(x0, y0, (1 - fx) * (1 - fy))
            + corner(x0 + 1, y0, fx * (1 - fy))
            + corner(x0, y0 + 1, (1 - fx) * fy)
            + corner(x0 + 1, y0 + 1, fx * fy))


def reference_depth(features, proj_matrices, depth_values, num_depth,
                    w_oihw, gamma, beta, w_proj, eps=1e-5):
    V = len(features)
    B, C, H, W = features[0].shape
    D = num_depth
    HW = H * W
    ref = features[0].reshape(B, C, 1, HW)
    vol_sum = jnp.broadcast_to(ref, (B, C, D, HW)).astype(jnp.float32)
    vol_sq = vol_sum ** 2
    in_masks = jnp.ones((B, 1, D, HW), jnp.float32)
    for v in range(1, V):
        xz, yz, mask = _compute_src_coords(proj_matrices[:, v], depth_values)
        w = _grid_sample_ref(features[v], xz, yz)
        vol_sum = vol_sum + w
        vol_sq = vol_sq + w ** 2
        in_masks = in_masks + mask.reshape(B, 1, D, HW)
    cnt = 1.0 / in_masks
    vf = vol_sq * cnt - (vol_sum * cnt) ** 2
    x = vf.reshape(B, C, D, H, W).transpose(0, 2, 3, 4, 1).reshape(B * D, H, W, C)
    y = lax.conv_general_dilated(
        x, jnp.transpose(w_oihw, (2, 3, 1, 0)), (1, 1), ((1, 1), (1, 1)),
        dimension_numbers=("NHWC", "HWIO", "NHWC"),
        preferred_element_type=jnp.float32)
    mean = y.mean(axis=(0, 1, 2))
    var = y.var(axis=(0, 1, 2))
    z = jnp.maximum((y - mean) / jnp.sqrt(var + eps) * gamma + beta, 0.0)
    cost = jnp.einsum("nhwc,c->nhw", z, w_proj).reshape(B, D, H, W)
    p = jax.nn.softmax(cost, axis=1)
    return jnp.sum(p * depth_values, axis=1)


if __name__ == "__main__":
    B, C, H, W, D, V, Cmid = 2, 4, 16, 16, 8, 3, 8

    key = jax.random.PRNGKey(0)
    kf, kr, kt, kw1, kw2 = jax.random.split(key, 5)
    features = [jax.random.normal(k, (B, C, H, W), jnp.float32)
                for k in jax.random.split(kf, V)]
    R = (jnp.eye(3, dtype=jnp.float32)[None, None]
         + 0.05 * jax.random.normal(kr, (B, V, 3, 3), jnp.float32))
    T = 0.1 * jax.random.normal(kt, (B, V, 3, 1), jnp.float32)
    proj_matrices = jnp.concatenate([R, T], axis=-1)         # (B, V, 3, 4)
    depth_values = jnp.broadcast_to(
        jnp.linspace(0.8, 1.6, D, dtype=jnp.float32).reshape(1, D, 1, 1),
        (B, D, H, W))

    # cost_regularization is an external nn.Module argument in the spec;
    # stand-in: Pallas ConvBnReLU(3x3, C->Cmid) + 1x1 conv head (Cmid->1).
    w1 = 0.1 * jax.random.normal(kw1, (Cmid, C, 3, 3), jnp.float32)
    gamma = jnp.ones((Cmid,), jnp.float32)
    beta = jnp.zeros((Cmid,), jnp.float32)
    w2 = 0.1 * jax.random.normal(kw2, (Cmid,), jnp.float32)
    cost_regularization = make_cost_regularization(w1, gamma, beta, w2, H, W)

    out = depth_net_forward(features, proj_matrices, depth_values, D,
                            cost_regularization)
    depth = jax.block_until_ready(out["depth"])
    assert depth.shape == (B, H, W)
    assert bool(jnp.all(jnp.isfinite(depth)))

    ref = jax.block_until_ready(
        reference_depth(features, proj_matrices, depth_values, D,
                        w1, gamma, beta, w2))
    max_err = float(jnp.max(jnp.abs(depth - ref)))
    assert jnp.allclose(depth, ref, atol=5e-2, rtol=5e-2), max_err

    print("KERNEL_OK")
</pallas_src>

<mosaic_0001>
module attributes {stable_mosaic.version = 11 : i64} {
  func.func @kernel(%arg0: i32, %arg1: i32, %arg2: memref<2x1x1x1x256xf32, #tpu.memory_space<vmem>>, %arg3: memref<2x1x1x1x256xf32, #tpu.memory_space<vmem>>, %arg4: memref<1x4x256xf32, #tpu.memory_space<vmem>>, %arg5: memref<2x1x4x256xf32, #tpu.memory_space<vmem>>, %arg6: memref<1x1x1x256xf32, #tpu.memory_space<vmem>>, %arg7: memref<1x1x4x256xf32, #tpu.memory_space<vmem>>) attributes {dimension_semantics = [#tpu.dimension_semantics<parallel>, #tpu.dimension_semantics<parallel>], iteration_bounds = array<i64: 2, 8>, scalar_prefetch = 0 : i64, scratch_operands = 0 : i64, tpu.core_type = #tpu.core_type<tc>, window_params = [{transform_indices = @transform_0, window_bounds = array<i64: 2, 1, 1, 1, 256>}, {transform_indices = @transform_1, window_bounds = array<i64: 2, 1, 1, 1, 256>}, {transform_indices = @transform_2, window_bounds = array<i64: 1, 4, 256>}, {transform_indices = @transform_3, window_bounds = array<i64: 2, 1, 4, 256>}, {transform_indices = @transform_4, window_bounds = array<i64: 1, 1, 1, 256>}, {transform_indices = @transform_5, window_bounds = array<i64: 1, 1, 4, 256>}]} {
    %0 = tpu.iota {dimensions = array<i32: 0>} : vector<256x1xi32>
    %1 = arith.sitofp %0 : vector<256x1xi32> to vector<256x1xf32>
    %cst = arith.constant 1.600000e+01 : f32
    %2 = vector.broadcast %cst : f32 to vector<256x1xf32>
    %3 = arith.divf %1, %2 : vector<256x1xf32>
    %4 = math.floor %3 : vector<256x1xf32>
    %cst_0 = arith.constant 1.600000e+01 : f32
    %5 = vector.broadcast %cst_0 : f32 to vector<256x1xf32>
    %6 = arith.mulf %4, %5 : vector<256x1xf32>
    %7 = arith.subf %1, %6 : vector<256x1xf32>
    %c0 = arith.constant 0 : index
    %c0_1 = arith.constant 0 : index
    %c0_2 = arith.constant 0 : index
    %8 = vector.load %arg4[%c0, %c0_1, %c0_2] : memref<1x4x256xf32, #tpu.memory_space<vmem>>, vector<1x4x256xf32>
    %9 = vector.shape_cast %8 : vector<1x4x256xf32> to vector<4x256xf32>
    %10 = arith.mulf %9, %9 : vector<4x256xf32>
    %c0_3 = arith.constant 0 : index
    %c0_4 = arith.constant 0 : index
    %c0_5 = arith.constant 0 : index
    %c0_6 = arith.constant 0 : index
    %c0_7 = arith.constant 0 : index
    %11 = vector.load %arg2[%c0_3, %c0_4, %c0_5, %c0_6, %c0_7] : memref<2x1x1x1x256xf32, #tpu.memory_space<vmem>>, vector<1x1x1x1x256xf32>
    %12 = vector.shape_cast %11 : vector<1x1x1x1x256xf32> to vector<1x256xf32>
    %c0_8 = arith.constant 0 : index
    %c0_9 = arith.constant 0 : index
    %c0_10 = arith.constant 0 : index
    %c0_11 = arith.constant 0 : index
    %c0_12 = arith.constant 0 : index
    %13 = vector.load %arg3[%c0_8, %c0_9, %c0_10, %c0_11, %c0_12] : memref<2x1x1x1x256xf32, #tpu.memory_space<vmem>>, vector<1x1x1x1x256xf32>
    %14 = vector.shape_cast %13 : vector<1x1x1x1x256xf32> to vector<1x256xf32>
    %15 = vector.broadcast %12 : vector<1x256xf32> to vector<256x256xf32>
    %16 = vector.broadcast %7 : vector<256x1xf32> to vector<256x256xf32>
    %17 = arith.subf %15, %16 : vector<256x256xf32>
    %18 = math.absf %17 : vector<256x256xf32>
    %cst_13 = arith.constant 1.000000e+00 : f32
    %19 = vector.broadcast %cst_13 : f32 to vector<256x256xf32>
    %20 = arith.subf %19, %18 : vector<256x256xf32>
    %cst_14 = arith.constant 0.000000e+00 : f32
    %21 = vector.broadcast %cst_14 : f32 to vector<256x256xf32>
    %22 = arith.maximumf %20, %21 : vector<256x256xf32>
    %23 = vector.broadcast %14 : vector<1x256xf32> to vector<256x256xf32>
    %24 = vector.broadcast %4 : vector<256x1xf32> to vector<256x256xf32>
    %25 = arith.subf %23, %24 : vector<256x256xf32>
    %26 = math.absf %25 : vector<256x256xf32>
    %cst_15 = arith.constant 1.000000e+00 : f32
    %27 = vector.broadcast %cst_15 : f32 to vector<256x256xf32>
    %28 = arith.subf %27, %26 : vector<256x256xf32>
    %cst_16 = arith.constant 0.000000e+00 : f32
    %29 = vector.broadcast %cst_16 : f32 to vector<256x256xf32>
    %30 = arith.maximumf %28, %29 : vector<256x256xf32>
    %c0_17 = arith.constant 0 : index
    %c0_18 = arith.constant 0 : index
    %c0_19 = arith.constant 0 : index
    %c0_20 = arith.constant 0 : index
    %31 = vector.load %arg5[%c0_17, %c0_18, %c0_19, %c0_20] : memref<2x1x4x256xf32, #tpu.memory_space<vmem>>, vector<1x1x4x256xf32>
    %32 = vector.shape_cast %31 : vector<1x1x4x256xf32> to vector<4x256xf32>
    %33 = arith.mulf %22, %30 : vector<256x256xf32>
    %cst_21 = arith.constant dense<0.000000e+00> : vector<4x256xf32>
    %34 = tpu.matmul %32, %33, %cst_21 {dimension_numbers = #tpu.dot_dimension_numbers<[1], [0], [0], [1], [0, 0, 1, 1], [], []>} : vector<4x256xf32>, vector<256x256xf32>, vector<4x256xf32> -> vector<4x256xf32>
    %35 = arith.addf %9, %34 : vector<4x256xf32>
    %36 = arith.mulf %34, %34 : vector<4x256xf32>
    %37 = arith.addf %10, %36 : vector<4x256xf32>
    %c1 = arith.constant 1 : index
    %c0_22 = arith.constant 0 : index
    %c0_23 = arith.constant 0 : index
    %c0_24 = arith.constant 0 : index
    %c0_25 = arith.constant 0 : index
    %38 = vector.load %arg2[%c1, %c0_22, %c0_23, %c0_24, %c0_25] : memref<2x1x1x1x256xf32, #tpu.memory_space<vmem>>, vector<1x1x1x1x256xf32>
    %39 = vector.shape_cast %38 : vector<1x1x1x1x256xf32> to vector<1x256xf32>
    %c1_26 = arith.constant 1 : index
    %c0_27 = arith.constant 0 : index
    %c0_28 = arith.constant 0 : index
    %c0_29 = arith.constant 0 : index
    %c0_30 = arith.constant 0 : index
    %40 = vector.load %arg3[%c1_26, %c0_27, %c0_28, %c0_29, %c0_30] : memref<2x1x1x1x256xf32, #tpu.memory_space<vmem>>, vector<1x1x1x1x256xf32>
    %41 = vector.shape_cast %40 : vector<1x1x1x1x256xf32> to vector<1x256xf32>
    %42 = vector.broadcast %39 : vector<1x256xf32> to vector<256x256xf32>
    %43 = vector.broadcast %7 : vector<256x1xf32> to vector<256x256xf32>
    %44 = arith.subf %42, %43 : vector<256x256xf32>
    %45 = math.absf %44 : vector<256x256xf32>
    %cst_31 = arith.constant 1.000000e+00 : f32
    %46 = vector.broadcast %cst_31 : f32 to vector<256x256xf32>
    %47 = arith.subf %46, %45 : vector<256x256xf32>
    %cst_32 = arith.constant 0.000000e+00 : f32
    %48 = vector.broadcast %cst_32 : f32 to vector<256x256xf32>
    %49 = arith.maximumf %47, %48 : vector<256x256xf32>
    %50 = vector.broadcast %41 : vector<1x256xf32> to vector<256x256xf32>
    %51 = vector.broadcast %4 : vector<256x1xf32> to vector<256x256xf32>
    %52 = arith.subf %50, %51 : vector<256x256xf32>
    %53 = math.absf %52 : vector<256x256xf32>
    %cst_33 = arith.constant 1.000000e+00 : f32
    %54 = vector.broadcast %cst_33 : f32 to vector<256x256xf32>
    %55 = arith.subf %54, %53 : vector<256x256xf32>
    %cst_34 = arith.constant 0.000000e+00 : f32
    %56 = vector.broadcast %cst_34 : f32 to vector<256x256xf32>
    %57 = arith.maximumf %55, %56 : vector<256x256xf32>
    %c1_35 = arith.constant 1 : index
    %c0_36 = arith.constant 0 : index
    %c0_37 = arith.constant 0 : index
    %c0_38 = arith.constant 0 : index
    %58 = vector.load %arg5[%c1_35, %c0_36, %c0_37, %c0_38] : memref<2x1x4x256xf32, #tpu.memory_space<vmem>>, vector<1x1x4x256xf32>
    %59 = vector.shape_cast %58 : vector<1x1x4x256xf32> to vector<4x256xf32>
    %60 = arith.mulf %49, %57 : vector<256x256xf32>
    %cst_39 = arith.constant dense<0.000000e+00> : vector<4x256xf32>
    %61 = tpu.matmul %59, %60, %cst_39 {dimension_numbers = #tpu.dot_dimension_numbers<[1], [0], [0], [1], [0, 0, 1, 1], [], []>} : vector<4x256xf32>, vector<256x256xf32>, vector<4x256xf32> -> vector<4x256xf32>
    %62 = arith.addf %35, %61 : vector<4x256xf32>
    %63 = arith.mulf %61, %61 : vector<4x256xf32>
    %64 = arith.addf %37, %63 : vector<4x256xf32>
    %c0_40 = arith.constant 0 : index
    %c0_41 = arith.constant 0 : index
    %c0_42 = arith.constant 0 : index
    %c0_43 = arith.constant 0 : index
    %65 = vector.load %arg6[%c0_40, %c0_41, %c0_42, %c0_43] : memref<1x1x1x256xf32, #tpu.memory_space<vmem>>, vector<1x1x1x256xf32>
    %66 = vector.shape_cast %65 : vector<1x1x1x256xf32> to vector<1x256xf32>
    %cst_44 = arith.constant 1.000000e+00 : f32
    %67 = vector.broadcast %cst_44 : f32 to vector<1x256xf32>
    %68 = arith.divf %67, %66 : vector<1x256xf32>
    %69 = vector.broadcast %68 : vector<1x256xf32> to vector<4x256xf32>
    %70 = arith.mulf %62, %69 : vector<4x256xf32>
    %71 = vector.broadcast %68 : vector<1x256xf32> to vector<4x256xf32>
    %72 = arith.mulf %64, %71 : vector<4x256xf32>
    %73 = arith.mulf %70, %70 : vector<4x256xf32>
    %74 = arith.subf %72, %73 : vector<4x256xf32>
    %c0_45 = arith.constant 0 : index
    %c0_46 = arith.constant 0 : index
    %c0_47 = arith.constant 0 : index
    %c0_48 = arith.constant 0 : index
    %75 = vector.load %arg7[%c0_45, %c0_46, %c0_47, %c0_48] : memref<1x1x4x256xf32, #tpu.memory_space<vmem>>, vector<1x1x4x256xf32>
    %76 = vector.shape_cast %75 : vector<1x1x4x256xf32> to vector<4x256xf32>
    %77 = vector.shape_cast %74 : vector<4x256xf32> to vector<1x1x4x256xf32>
    tpu.vector_store %arg7[%c0_45, %c0_46, %c0_47, %c0_48], %77 {strides = array<i32>} : memref<1x1x4x256xf32, #tpu.memory_space<vmem>>, vector<1x1x4x256xf32>,
    return
  }
  func.func @transform_0(%arg0: i32, %arg1: i32) -> (i32, i32, i32, i32, i32) {
    %c0_i32 = arith.constant 0 : i32
    %c0_i32_0 = arith.constant 0 : i32
    %c0_i32_1 = arith.constant 0 : i32
    %c0_i32_2 = arith.constant 0 : i32
    return %c0_i32, %arg0, %arg1, %c0_i32_0, %c0_i32_1 : i32, i32, i32, i32, i32
  }
  func.func @transform_1(%arg0: i32, %arg1: i32) -> (i32, i32, i32, i32, i32) {
    %c0_i32 = arith.constant 0 : i32
    %c0_i32_0 = arith.constant 0 : i32
    %c0_i32_1 = arith.constant 0 : i32
    %c0_i32_2 = arith.constant 0 : i32
    return %c0_i32, %arg0, %arg1, %c0_i32_0, %c0_i32_1 : i32, i32, i32, i32, i32
  }
  func.func @transform_2(%arg0: i32, %arg1: i32) -> (i32, i32, i32) {
    %c0_i32 = arith.constant 0 : i32
    %c0_i32_0 = arith.constant 0 : i32
    %c0_i32_1 = arith.constant 0 : i32
    return %arg0, %c0_i32, %c0_i32_0 : i32, i32, i32
  }
  func.func @transform_3(%arg0: i32, %arg1: i32) -> (i32, i32, i32, i32) {
    %c0_i32 = arith.constant 0 : i32
    %c0_i32_0 = arith.constant 0 : i32
    %c0_i32_1 = arith.constant 0 : i32
    %c0_i32_2 = arith.constant 0 : i32
    return %c0_i32, %arg0, %c0_i32_0, %c0_i32_1 : i32, i32, i32, i32
  }
  func.func @transform_4(%arg0: i32, %arg1: i32) -> (i32, i32, i32, i32) {
    %c0_i32 = arith.constant 0 : i32
    %c0_i32_0 = arith.constant 0 : i32
    %c0_i32_1 = arith.constant 0 : i32
    return %arg0, %arg1, %c0_i32, %c0_i32_0 : i32, i32, i32, i32
  }
  func.func @transform_5(%arg0: i32, %arg1: i32) -> (i32, i32, i32, i32) {
    %c0_i32 = arith.constant 0 : i32
    %c0_i32_0 = arith.constant 0 : i32
    %c0_i32_1 = arith.constant 0 : i32
    return %arg0, %arg1, %c0_i32, %c0_i32_0 : i32, i32, i32, i32
  }
}

</mosaic_0001>

<bundles_post_ra>
// kernel: tpu_custom_call.1
= control target key start
LH: loop header
LB: loop body
LE: loop exit
PB: predicated region body
PF: predicated region fallthrough
CT: control target
= control target key end

     0   :  { %s4033_s0 = inlined_call_operand.hbm [shape: f32[2,2,8,1,256], index: 0, kind: input, shape index: {}]   ;;  %s4034_s1 = inlined_call_operand.hbm [shape: f32[2,2,8,1,256], index: 1, kind: input, shape index: {}]   ;;  %s4035_s2 = inlined_call_operand.hbm [shape: f32[2,4,256], index: 2, kind: input, shape index: {}]   ;;  %s4036_s3 = inlined_call_operand.hbm [shape: f32[2,2,4,256], index: 3, kind: input, shape index: {}]   ;;  %s4037_s4 = inlined_call_operand.hbm [shape: f32[2,8,1,256], index: 4, kind: input, shape index: {}]   ;;  %s4038_s5 = inlined_call_operand.hbm [shape: f32[2,8,4,256], index: 5, kind: output, shape index: {}]  }
   0x1   :  { %4071 = sst [smem:[#allocation32_spill]] %s4034_s1 }
   0x2   :  { %4072 = sst [smem:[#allocation33_spill]] %s4036_s3 }
   0x3   :  { %4073 = sst [smem:[#allocation34_spill]] %s4038_s5 }
   0x4   :  { %10 = vsyncpa [#allocation3], 0 }
   0x5   :  { %12 = vsyncpa [#allocation3 + $0x1], 0 }
   0x6   :  { %13 = vsyncpa [#allocation6], 0 }
   0x7   :  { %15 = vsyncpa [#allocation6 + $0x1], 0 }
   0x8   :  { %16 = vsyncpa [#allocation9], 0 }
   0x9   :  { %18 = vsyncpa [#allocation9 + $0x1], 0 }
   0xa   :  { %19 = vsyncpa [#allocation4], 0 }
   0xb   :  { %21 = vsyncpa [#allocation4 + $0x1], 0  ;;  %s2839_s18 = smov 0   ;;  %s2841_s19 = smov 0  }
   0xc   :  { %s2843_s20 = smov 0   ;;  %s2845_s21 = smov 0  }
   0xd   :  { %s2847_s22 = smov 0   ;;  %s2849_s23 = smov 0  }
   0xe   :  { %s2851_s24 = smov 0   ;;  %s2853_s25 = smov 0  }
   0xf   :  { %s2855_s26 = smov 0   ;;  %s2857_s27 = smov 0  }
  0x10   :  { %s2859_s28 = smov 0  }
  0x11 LB: > { %4074 = sst [smem:[#allocation18_spill]] %s2759_s19  ;;  %s2895_s29 = sadd.s32 4294967295, %s2795_s28   ;;  %s2795_s28 = sphi %s2859_s28, %s27_s28   ;;  %s2791_s27 = sphi %s2857_s27, %s4142_s27   ;;  %s2787_s26 = sphi %s2855_s26, %s4135_s26   ;;  %s2783_s25 = sphi %s2853_s25, %s4141_s25   ;;  %s2779_s24 = sphi %s2851_s24, %s4134_s24   ;;  %s2775_s23 = sphi %s2849_s23, %s4133_s23   ;;  %s2771_s22 = sphi %s2847_s22, %s4140_s22   ;;  %s2767_s21 = sphi %s2845_s21, %s4139_s21   ;;  %s2763_s20 = sphi %s2843_s20, %s4138_s20   ;;  %s2759_s19 = sphi %s2841_s19, %s4137_s19   ;;  %s2755_s18 = sphi %s2839_s18, %s4130_s18  }
  0x12   : > { %4075 = sst [smem:[#allocation19_spill]] %s2767_s21  ;;  %s2208_s30 = sadd.s32 4294967294, %s2795_s28  }
  0x13   : > { %4076 = sst [smem:[#allocation20_spill]] %s2775_s23  ;;  %s36_s6 = sadd.s32 1, %s2787_s26 }
  0x14   : > { %4077 = sst [smem:[#allocation21_spill]] %s2779_s24  ;;  %s39_s7 = sadd.s32 1, %s2791_s27 }
  0x15   : > { %4078 = sst [smem:[#allocation22_spill]] %s2783_s25  ;;  %p37_p0 = scmp.ge.s32.totalorder %s36_s6, 8 }
  0x16   : > { %4079 = sst [smem:[#allocation23_spill]] %s2787_s26  ;;  %s48_s8 = sadd.s32 1, %s2775_s23 }
  0x17   : > { %4080 = sst [smem:[#allocation24_spill]] %s2795_s28  ;;  %p55_p1 = scmp.ne.s32.totalorder %s2775_s23, %s2771_s22 }
  0x18   : > { %p4049_p2 = scmp.eq.s32.totalorder %s2795_s28, 0  ;;  %s4144_s6 = smov (%p37_p0, %s36_s6), 0 }
  0x19   : > { %4081 = sst [smem:[#allocation25_spill]] %s4144_s6  ;;  %s4146_s7 = smov (!%p37_p0, %s39_s7), %s2791_s27 }
  0x1a   : > { %s44_s9 = ssub.s32 %s2787_s26, %s4144_s6  ;;  %p2911_p3 = por %p4049_p2, %p55_p1 }
  0x1b   : > { %p41_p4 = scmp.ge.s32.totalorder %s4146_s7, 2  ;;  %p61_p5 = scmp.ne.s32.totalorder %s2771_s22, %s2767_s21 }
  0x1c   : > { %p4048_p6 = scmp.eq.s32.totalorder %s2895_s29, 0  ;;  %p195_p7 = scmp.eq.s32.totalorder %s2895_s29, 15 }
  0x1d   : > { %s4148_s7 = smov (%p41_p4, %s4146_s7), 0  ;;  %p201_p10 = scmp.eq.s32.totalorder %s2208_s30, 15 }
  0x1e   : > { %4083 = sst [smem:[#allocation26_spill]] %s4148_s7  ;;  %p2923_p8 = por %p4048_p6, %p61_p5 }
  0x1f   : > { %p2927_p9 = por %p195_p7, %p55_p1  ;;  %s2933_s13 = ssub.s32 %s2791_s27, %s4148_s7 }
  0x20   : > { %s4084_s11 = scalar_select %p2923_p8, 1, 0 }
  0x21   : > { %s4085_s12 = scalar_select %p2927_p9, 1, 0 }
  0x22   : > { %s45_s14 = sor.u32 %s44_s9, %s2933_s13  ;;  %p2937_p13 = por %p201_p10, %p61_p5 }
  0x23   : > { %4086 = sst [smem:[#allocation27_spill]] %s4085_s12  ;;  %p46_p12 = scmp.eq.s32.totalorder %s45_s14, 0 }
  0x24   : > { %s4087_s15 = scalar_select %p2937_p13, 1, 0 }
  0x25   : > { %p4047_p0 = scmp.lt.s32.totalorder %s2795_s28, 16  ;;  %s2946_s17 = sand.u32 1, %s2775_s23  }
  0x26   : > { %4088 = sst [smem:[#allocation28_spill]] %s4087_s15  ;;  %s2212_s7 = sshll.u32 %s2787_s26, 1 }
  0x27   : > { %s2943_s16 = scalar_select %p46_p12, %s2775_s23, %s48_s8  }
  0x28   : > { %s4044_s6 = sshll.u32 %s2946_s17, 2  ;;  %s2213_s21 = sshll.u32 %s2791_s27, 4 }
  0x29   : > { %4089 = sst [smem:[#allocation29_spill]] %s2943_s16  ;;  %s231_s30 = sadd.s32 %s2213_s21, %s2212_s7 }
  0x2a   : > { %p2955_p1 = pnand %p4047_p0, %p2911_p3  ;;  %s2959_s14 = sshll.u32 %s231_s30, 4 }
  0x2b   : > { %s4050_s8 = sand.u32 1, %s2795_s28   ;;  %s4091_s1 = sld [smem:[#allocation32_spill]] }
  0x2c   : > { %s4090_s9 = scalar_select %p2955_p1, 1, 0 }
  0x2d   : > { %s248_s21 = scalar_lea.vmem [#allocation5], %s4044_s6  ;;  %s2975_s10 = scalar_lea.sflag [#allocation6], %s4050_s8 }
  0x2e   : > { %s257_s7 = sshll.u32 %s248_s21, 4  ;;  %p2981_p5 = pneg %p2955_p1  ;;  %s2970_s7 = int_to_ptr.vmem [resolvable:$true] %s257_s7 }
  0x30   : > { %s4092_s23 = scalar_select %p2981_p5, 1, 0 }
  0x31   : > { %s2966_s15 = scalar_lea.hbm %s4091_s1, %s2959_s14  ;;  %s2512_s21 = scalar_lea.hbm %s4091_s1, 1024 }
  0x32   : > { %s2507_s30 = scalar_lea.hbm %s2966_s15, 64  ;;  %p2513_p12 = scmp.lt.u32.totalorder %s2966_s15, %s4091_s1 }
  0x33   : > { %p2508_p4 = scmp.ne.s32.totalorder %s2966_s15, %s2507_s30  ;;  %p2514_p0 = scmp.lt.u32.totalorder %s2512_s21, %s2507_s30 }
  0x34   : > { %p2516_p2 = scmp.lt.u32.totalorder %s2507_s30, %s2966_s15 }
  0x35   : > { %p2510_p7 = pnand %p2981_p5, %p2508_p4  ;;  %p2515_p6 = por %p2514_p0, %p2513_p12 }
  0x37   : > { %p2511_p10 = pneg %p2510_p7  ;;  %p2517_p11 = por %p2516_p2, %p2515_p6 }
  0x39   : > { %p2518_p3 = pnand %p2517_p11, %p2511_p10 }
  0x3b   : > { %2521 = shalt.err (!%p2518_p3)
}
  0x3c   : > { %s2522_s8 = scalar_lea.vmem %s2970_s7, 64  ;;  %s2797_s6 = smov [#allocation5]  }
  0x3d   : > { %p2523_p4 = scmp.ne.s32.totalorder %s2970_s7, %s2522_s8  ;;  %s2527_s16 = sshll.u32 %s2797_s6, 4  ;;  %s2528_s16 = int_to_ptr.vmem [resolvable:$false] %s2527_s16 }
  0x3e   : > { %s2529_s5 = scalar_lea.vmem %s2528_s16, 128  ;;  %p2530_p9 = scmp.lt.s32.totalorder %s2970_s7, %s2528_s16 }
  0x3f   : > { %p2525_p7 = pnand %p2523_p4, %p2981_p5  ;;  %p2531_p8 = scmp.lt.s32.totalorder %s2529_s5, %s2522_s8 }
  0x41   : > { %p2526_p13 = pneg %p2525_p7  ;;  %p2532_p0 = por %p2531_p8, %p2530_p9 }
  0x43   : > { %p2533_p12 = pnand %p2532_p0, %p2526_p13 }
  0x45   : > { %2536 = shalt.err (!%p2533_p12)
}
  0x46   : > { %s4053_s26 = smov 512   ;;  %s4054_s8 = smov 32  }
  0x47   : > { %s4055_s30 = smov 2   ;;  %p326_p2 = scmp.lt.s32.totalorder %s2795_s28, 17 }
  0x48   : > { %2393 = dma.hbm_to_vmem [thread:$0]  (!%p2955_p1), %s2966_s15, 64, %s2970_s7, %s2975_s10, %s4053_s26, %s4054_s8, %s4055_s30  }
  0x49   : > { %p4093_p6 = scmp.ge.s32.totalorder %s2795_s28, 1  ;;  %s102_s6 = sadd.s32 1, %s2763_s20 }
  0x4a   : > { %p109_p9 = scmp.ne.s32.totalorder %s2763_s20, %s2759_s19  ;;  %p4095_p11 = scmp.eq.s32.totalorder %s2933_s13, 0 }
  0x4b   : > { %p3011_p8 = pnand %p4093_p6, %p326_p2  ;;  %p4097_p13 = scmp.eq.s32.totalorder %s2795_s28, 0 }
  0x4c   : > { %s3021_s16 = scalar_select %p4095_p11, %s2763_s20, %s102_s6  }
  0x4d   : > { %s4094_s21 = scalar_select %p3011_p8, 1, 0 }
  0x4e   : > { %4096 = sst [smem:[#allocation30_spill]] %s3021_s16  ;;  %p111_p3 = por %p109_p9, %p4097_p13 }
  0x4f   : > { %p115_p10 = scmp.ne.s32.totalorder %s2759_s19, %s2755_s18  ;;  %s4059_s5 = sand.u32 1, %s2763_s20  }
  0x50   : > { %s4058_s1 = sshll.u32 %s2791_s27, 7  ;;  %p4098_p4 = scmp.eq.s32.totalorder %s2895_s29, 0 }
  0x51   : > { %p4101_p0 = scmp.lt.s32.totalorder %s2795_s28, 16  ;;  %s2222_s13 = sshll.u32 %s4059_s5, 4 }
  0x52   : > { %p3031_p7 = por %p115_p10, %p4098_p4  ;;  %s4103_s3 = sld [smem:[#allocation33_spill]] }
  0x53   : > { %p3037_p12 = pnand %p4101_p0, %p111_p3  ;;  %s290_s8 = scalar_lea.vmem [#allocation8], %s2222_s13 }
  0x54   : > { %s4099_s15 = scalar_select %p3031_p7, 1, 0 }
  0x55   : > { %s297_s30 = sshll.u32 %s290_s8, 4  ;;  %s4104_s16 = sand.u32 1, %s2795_s28   ;;  %s3050_s30 = int_to_ptr.vmem [resolvable:$true] %s297_s30 }
  0x56   : > { %4100 = sst [smem:[#allocation31_spill]] %s4099_s15  ;;  %s3054_s12 = scalar_lea.sflag [#allocation9], %s4104_s16 }
  0x57   : > { %p4068_p6 = pneg %p3037_p12 }
  0x58   : > { %s3048_s18 = scalar_lea.hbm %s4103_s3, %s4058_s1  ;;  %s2542_s1 = scalar_lea.hbm %s4103_s3, 512 }
  0x59   : > { %s2537_s25 = scalar_lea.hbm %s3048_s18, 256  ;;  %p2543_p13 = scmp.lt.u32.totalorder %s3048_s18, %s4103_s3 }
  0x5a   : > { %p2538_p2 = scmp.ne.s32.totalorder %s3048_s18, %s2537_s25  ;;  %p2544_p3 = scmp.lt.u32.totalorder %s2542_s1, %s2537_s25 }
  0x5b   : > { %p2546_p4 = scmp.lt.u32.totalorder %s2537_s25, %s3048_s18 }
  0x5c   : > { %p2540_p9 = pnand %p4068_p6, %p2538_p2  ;;  %p2545_p10 = por %p2544_p3, %p2543_p13 }
  0x5e   : > { %p2541_p11 = pneg %p2540_p9  ;;  %p2547_p0 = por %p2546_p4, %p2545_p10 }
  0x60   : > { %p2548_p7 = pnand %p2547_p0, %p2541_p11 }
  0x62   : > { %2551 = shalt.err (!%p2548_p7)
}
  0x63   : > { %s2552_s8 = scalar_lea.vmem %s3050_s30, 256  ;;  %s2801_s16 = smov [#allocation8]  }
  0x64   : > { %p2553_p2 = scmp.ne.s32.totalorder %s3050_s30, %s2552_s8  ;;  %s2557_s26 = sshll.u32 %s2801_s16, 4  ;;  %s2558_s26 = int_to_ptr.vmem [resolvable:$false] %s2557_s26 }
  0x65   : > { %s2559_s5 = scalar_lea.vmem %s2558_s26, 512  ;;  %p2560_p1 = scmp.lt.s32.totalorder %s3050_s30, %s2558_s26 }
  0x66   : > { %p2555_p9 = pnand %p2553_p2, %p4068_p6  ;;  %p2561_p13 = scmp.lt.s32.totalorder %s2559_s5, %s2552_s8 }
  0x68   : > { %p2556_p8 = pneg %p2555_p9  ;;  %p2562_p3 = por %p2561_p13, %p2560_p1 }
  0x6a   : > { %p2563_p10 = pnand %p2562_p3, %p2556_p8 }
  0x6c   : > { %2566 = shalt.err (!%p2563_p10)
}
  0x6d   : > { %s2802_s1 = smov 256   ;;  %s2803_s25 = smov 128  }
  0x6e   : > { %s2804_s6 = smov 8   ;;  %s3086_s8 = scalar_lea.hbm %s4033_s0, %s2959_s14 }
  0x6f   : > { %2399 = dma.hbm_to_vmem [thread:$0]  (!%p3037_p12), %s3048_s18, 256, %s3050_s30, %s3054_s12, %s2802_s1, %s2803_s25, %s2804_s6  }
  0x70   : > { %s4105_s26 = sshll.u32 %s2946_s17, 2  ;;  %s4106_s28 = sand.u32 1, %s2763_s20  }
  0x71   : > { %s225_s5 = scalar_lea.vmem [#allocation2], %s4105_s26  ;;  %s3094_s24 = sshll.u32 %s4106_s28, 3 }
  0x72   : > { %s234_s3 = sshll.u32 %s225_s5, 4  ;;  %s222_s15 = scalar_lea.sflag [#allocation3], %s2946_s17  ;;  %s3090_s3 = int_to_ptr.vmem [resolvable:$true] %s234_s3 }
  0x73   : > { %s2567_s19 = scalar_lea.hbm %s3086_s8, 64  ;;  %s2572_s1 = scalar_lea.hbm %s4033_s0, 1024 }
  0x74   : > { %p2568_p1 = scmp.ne.s32.totalorder %s3086_s8, %s2567_s19  ;;  %p2573_p11 = scmp.lt.u32.totalorder %s3086_s8, %s4033_s0 }
  0x75   : > { %p2574_p4 = scmp.lt.u32.totalorder %s2572_s1, %s2567_s19  ;;  %p2576_p2 = scmp.lt.u32.totalorder %s2567_s19, %s3086_s8 }
  0x76   : > { %p2570_p8 = pnand %p2568_p1, %p2981_p5 }
  0x77   : > { %p2575_p0 = por %p2574_p4, %p2573_p11 }
  0x78   : > { %p2571_p7 = pneg %p2570_p8 }
  0x79   : > { %p2577_p9 = por %p2576_p2, %p2575_p0 }
  0x7b   : > { %p2578_p13 = pnand %p2577_p9, %p2571_p7 }
  0x7d   : > { %2581 = shalt.err (!%p2578_p13)
}
  0x7e   : > { %s2582_s28 = scalar_lea.vmem %s3090_s3, 64  ;;  %s2805_s13 = smov [#allocation2]  }
  0x7f   : > { %p2583_p3 = scmp.ne.s32.totalorder %s3090_s3, %s2582_s28  ;;  %s2587_s16 = sshll.u32 %s2805_s13, 4  ;;  %s2588_s16 = int_to_ptr.vmem [resolvable:$false] %s2587_s16 }
  0x80   : > { %s2589_s26 = scalar_lea.vmem %s2588_s16, 128  ;;  %p2590_p8 = scmp.lt.s32.totalorder %s3090_s3, %s2588_s16 }
  0x81   : > { %p2585_p10 = pnand %p2583_p3, %p2981_p5  ;;  %p2591_p6 = scmp.lt.s32.totalorder %s2589_s26, %s2582_s28 }
  0x83   : > { %p2586_p1 = pneg %p2585_p10  ;;  %p2592_p11 = por %p2591_p6, %p2590_p8 }
  0x85   : > { %p2593_p4 = pnand %p2592_p11, %p2586_p1 }
  0x87   : > { %2596 = shalt.err (!%p2593_p4)
}
  0x88   : > { %p4107_p7 = scmp.ne.s32.totalorder %s4090_s9, 0  ;;  %s4108_s19 = smov 2  }
  0x89   : > { %s4109_s5 = smov 32   ;;  %s4110_s30 = smov 512  }
  0x8a   : > { %2390 = dma.hbm_to_vmem [thread:$0]  (!%p4107_p7), %s3086_s8, 64, %s3090_s3, %s222_s15, %s4110_s30, %s4109_s5, %s4108_s19  }
  0x8b   : > { %s4111_s18 = sshll.u32 %s2791_s27, 7  ;;  %s271_s28 = scalar_lea.vmem [#allocation7], %s3094_s24 }
  0x8c   : > { %s3128_s6 = scalar_lea.hbm %s4035_s2, %s4111_s18  ;;  %s279_s13 = sshll.u32 %s271_s28, 4  ;;  %s280_s13 = int_to_ptr.vmem [resolvable:$true] %s279_s13 }
  0x8d   : > { %s2225_s16 = sshll.u32 %s2946_s17, 1  ;;  %s2597_s26 = scalar_lea.hbm %s3128_s6, 128 }
  0x8e   : > { %p2598_p6 = scmp.ne.s32.totalorder %s3128_s6, %s2597_s26  ;;  %p4112_p0 = pneg %p3037_p12 }
  0x8f   : > { %s2602_s8 = scalar_lea.hbm %s4035_s2, 256  ;;  %p2603_p13 = scmp.lt.u32.totalorder %s3128_s6, %s4035_s2 }
  0x90   : > { %p2600_p2 = pnand %p2598_p6, %p4112_p0  ;;  %p2604_p3 = scmp.lt.u32.totalorder %s2602_s8, %s2597_s26 }
  0x91   : > { %p2606_p1 = scmp.lt.u32.totalorder %s2597_s26, %s3128_s6 }
  0x92   : > { %p2601_p9 = pneg %p2600_p2  ;;  %p2605_p10 = por %p2604_p3, %p2603_p13 }
  0x94   : > { %p2607_p8 = por %p2606_p1, %p2605_p10 }
  0x96   : > { %p2608_p11 = pnand %p2607_p8, %p2601_p9 }
  0x98   : > { %2611 = shalt.err (!%p2608_p11)
}
  0x99   : > { %s2612_s24 = scalar_lea.vmem %s280_s13, 128  ;;  %p4113_p6 = pmov %p4112_p0 }
  0x9a   : > { %p2613_p4 = scmp.ne.s32.totalorder %s280_s13, %s2612_s24  ;;  %s2806_s30 = smov [#allocation7]  }
  0x9b   : > { %s2617_s18 = sshll.u32 %s2806_s30, 4  ;;  %s2618_s18 = int_to_ptr.vmem [resolvable:$false] %s2617_s18 }
  0x9c   : > { %p2615_p0 = pnand %p2613_p4, %p4113_p6  ;;  %s2619_s1 = scalar_lea.vmem %s2618_s18, 256 }
  0x9d   : > { %p2620_p7 = scmp.lt.s32.totalorder %s280_s13, %s2618_s18  ;;  %p2621_p5 = scmp.lt.s32.totalorder %s2619_s1, %s2612_s24 }
  0x9e   : > { %p2616_p2 = pneg %p2615_p0 }
  0x9f   : > { %p2622_p3 = por %p2621_p5, %p2620_p7 }
  0xa1   : > { %p2623_p13 = pnand %p2622_p3, %p2616_p2 }
  0xa3   : > { %2626 = shalt.err (!%p2623_p13)
}
  0xa4   : > { %2396 = dma.hbm_to_vmem [thread:$0]  (!%p3037_p12), %s3128_s6, 128, %s280_s13, %s2975_s10  }
  0xa5   : > { %s3156_s26 = scalar_lea.hbm %s4037_s4, %s2959_s14  ;;  %s311_s3 = scalar_lea.vmem [#allocation10], %s2225_s16 }
  0xa6   : > { %s321_s15 = sshll.u32 %s311_s3, 4  ;;  %s2627_s7 = scalar_lea.hbm %s3156_s26, 32  ;;  %s322_s15 = int_to_ptr.vmem [resolvable:$true] %s321_s15 }
  0xa7   : > { %p2628_p5 = scmp.ne.s32.totalorder %s3156_s26, %s2627_s7  ;;  %p4114_p7 = scmp.ne.s32.totalorder %s4092_s23, 0 }
  0xa8   : > { %s2632_s6 = scalar_lea.hbm %s4037_s4, 512  ;;  %p2633_p12 = scmp.lt.u32.totalorder %s3156_s26, %s4037_s4 }
  0xa9   : > { %p2630_p9 = pnand %p2628_p5, %p4114_p7  ;;  %p2634_p1 = scmp.lt.u32.totalorder %s2632_s6, %s2627_s7 }
  0xaa   : > { %p2636_p11 = scmp.lt.u32.totalorder %s2627_s7, %s3156_s26 }
  0xab   : > { %p2631_p10 = pneg %p2630_p9  ;;  %p2635_p8 = por %p2634_p1, %p2633_p12 }
  0xad   : > { %p2637_p4 = por %p2636_p11, %p2635_p8 }
  0xaf   : > { %p2638_p6 = pnand %p2637_p4, %p2631_p10 }
  0xb1   : > { %2641 = shalt.err (!%p2638_p6)
}
  0xb2   : > { %s2642_s17 = scalar_lea.vmem %s322_s15, 32  ;;  %s2807_s16 = smov [#allocation10]  }
  0xb3   : > { %p2643_p0 = scmp.ne.s32.totalorder %s322_s15, %s2642_s17  ;;  %s2647_s19 = sshll.u32 %s2807_s16, 4  ;;  %s2648_s19 = int_to_ptr.vmem [resolvable:$false] %s2647_s19 }
  0xb4   : > { %s2649_s5 = scalar_lea.vmem %s2648_s19, 64  ;;  %p2650_p13 = scmp.lt.s32.totalorder %s322_s15, %s2648_s19 }
  0xb5   : > { %p2645_p2 = pnand %p2643_p0, %p4114_p7  ;;  %p2651_p5 = scmp.lt.s32.totalorder %s2649_s5, %s2642_s17 }
  0xb7   : > { %p2646_p3 = pneg %p2645_p2  ;;  %p2652_p9 = por %p2651_p5, %p2650_p13 }
  0xb9   : > { %p2653_p1 = pnand %p2652_p9, %p2646_p3 }
  0xbb   : > { %2656 = shalt.err (!%p2653_p1)
}
  0xbc   : > { %p4115_p12 = scmp.ne.s32.totalorder %s4090_s9, 0  ;;  %p4116_p10 = scmp.ne.s32.totalorder %s4094_s21, 0 }
  0xbd   : > { %s3181_s23 = sand.u32 (!%p4116_p10), 1, %s2771_s22   ;;  %p4117_p7 = scmp.ne.s32.totalorder (!%p4116_p10), %s4084_s11, 0 }
  0xbe   : > { %2402 = dma.hbm_to_vmem [thread:$0]  (!%p4115_p12), %s3156_s26, 32, %s322_s15, %s3054_s12  }
  0xbf   : > { %330 = sbr.rel (%p4116_p10) target bundleno = 823 (0x337), region = 40  ;;  %s2230_s24 = sshll.u32 (!%p4116_p10), %s3181_s23, 2 }
  0xc0   : > { %s333_s30 = scalar_lea.sflag (!%p4116_p10), [#allocation3], %s3181_s23  ;;  %s3185_s18 = scalar_lea.vmem (!%p4116_p10), [#allocation2], %s2230_s24 }
  0xc6   : > { %2730 = dma.done.wait (%p4117_p7), %s333_s30, 64  }
  0xc7   : > { %2732 = vsyncadd (%p4117_p7), %s333_s30, 4294967232  ;;  %s341_s12 = sand.u32 1, %s2895_s29   ;;  %s3192_s21 = scalar_lea.vmem [#allocation5], %s2230_s24 }
  0xc8   : > { %s342_s9 = scalar_lea.sflag [#allocation6], %s341_s12 }
  0xc9   : > { %2734 = dma.done.wait (%p4117_p7), %s342_s9, 64  }
  0xca   : > { %2736 = vsyncadd (%p4117_p7), %s342_s9, 4294967232  ;;  %s4118_s1 = sld [smem:[#allocation18_spill]]  ;;  %s4119_s25 = sld [smem:[#allocation31_spill]] }
  0xd0   : > { %s352_s28 = sand.u32 1, %s4118_s1   ;;  %p4120_p8 = scmp.ne.s32.totalorder %s4119_s25, 0 }
  0xd1   : > { %s3199_s26 = sshll.u32 %s352_s28, 3 }
  0xd2   : > { %s354_s3 = scalar_lea.vmem [#allocation7], %s3199_s26 }
  0xd3   : > { %2738 = dma.done.wait (%p4120_p8), %s342_s9, 128  }
  0xd4   : > { %2740 = vsyncadd (%p4120_p8), %s342_s9, 4294967168  ;;  %s3206_s29 = sshll.u32 %s352_s28, 4  ;;  %s360_s15 = scalar_lea.sflag [#allocation9], %s341_s12 }
  0xd5   : > { %s363_s7 = scalar_lea.vmem [#allocation8], %s3206_s29 }
  0xd6   : > { %2742 = dma.done.wait (%p4120_p8), %s360_s15, 256  }
  0xd7   : > { %2744 = vsyncadd (%p4120_p8), %s360_s15, 4294967040  ;;  %s2234_s8 = sshll.u32 %s3181_s23, 1 }
  0xd8   : > { %s3214_s10 = scalar_lea.vmem [#allocation10], %s2234_s8 }
  0xd9   : > { %2746 = dma.done.wait (%p4117_p7), %s360_s15, 32  }
  0xda   : > { %2748 = vsyncadd (%p4117_p7), %s360_s15, 4294967264  ;;  %v419_v0 = vlaneseq  ;;  %v615_v14 = vld [vmem:[%s3185_s18] sm:$0x3]  ;;  %v616_v15 = vld [vmem:[%s3192_s21] sm:$0x3]  ;;  %s4121_s11 = sld [smem:[#allocation21_spill]] }
  0xdb   : > { %v2236_v16 = vld [vmem:[%s3185_s18 + $0x2] sm:$0x3]  ;;  %v2237_v25 = vld [vmem:[%s3192_s21 + $0x2] sm:$0x3]  ;;  %s4122_s6 = sld [smem:[#allocation22_spill]]  ;;  %s2235_s13 = sshll.u32 %s3181_s23, 3 }
  0xdc   : > { %v3220_v1 = vshrl.u32 %v419_v0, 7  ;;  %s4123_s16 = sld [smem:[#allocation27_spill]]  ;;  %s418_s24 = scalar_lea.vmem [#allocation11], %s2235_s13 }
  0xdd   : > { %s2028_s30 = sshll.u32 %s418_s24, 4  ;;  %s4124_s9 = sld [smem:[#allocation34_spill]]  ;;  %s3972_s30 = int_to_ptr.vmem [resolvable:$true] %s2028_s30 }
  0xde   : > { %v3223_v2 = vsub.s32 0, %v3220_v1  ;;  %v3226_v3 = vsub.s32 1, %v3220_v1  ;;  %v421_v4 = vadd.s32 8, %v3220_v1  ;;  %v452_v5 = vcvt.s32.f32 %v3220_v1  ;;  %s2012_s1 = scalar_lea.sflag [#allocation4], %s3181_s23  ;;  %s2657_s25 = scalar_lea.vmem %s3972_s30, 128 }
  0xdf   : > { %v3231_v6 = vadd.s32 16, %v3220_v1  ;;  %v3234_v7 = vadd.s32 24, %v3220_v1  ;;  %v3237_v8 = vadd.s32 32, %v3220_v1  ;;  %v3240_v9 = vadd.s32 40, %v3220_v1  ;;  %p2658_p11 = scmp.ne.s32.totalorder %s3972_s30, %s2657_s25  ;;  %s2808_s28 = smov [#allocation11]  }
  0xe0   : > { %v453_v10 = vcvt.s32.f32 %v421_v4  ;;  %v485_v11 = vmul.f32 0.0625, %v452_v5  ;;  %v3243_v12 = vadd.s32 48, %v3220_v1  ;;  %v3246_v13 = vadd.s32 56, %v3220_v1  ;;  %s2240_s14 = sshll.u32 %s4121_s11, 1  ;;  %s2661_s26 = sshll.u32 %s2808_s28, 4  ;;  %s2662_s26 = int_to_ptr.vmem [resolvable:$false] %s2661_s26 }
  0xe1   : > { %v454_v17 = vcvt.s32.f32 %v3231_v6  ;;  %v455_v18 = vcvt.s32.f32 %v3234_v7  ;;  %v456_v19 = vcvt.s32.f32 %v3237_v8  ;;  %v457_v20 = vcvt.s32.f32 %v3240_v9  ;;  %s2241_s17 = sshll.u32 %s4122_s6, 4  ;;  %p2664_p2 = scmp.lt.s32.totalorder %s3972_s30, %s2662_s26 }
  0xe2   : > { %v3256_v21 = vrot.slane %v615_v14, %v3223_v2  ;;  %v3259_v22 = vrot.slane %v615_v14, %v3226_v3  ;;  %v3262_v23 = vrot.slane %v616_v15, %v3223_v2  ;;  %v3265_v24 = vrot.slane %v616_v15, %v3226_v3  ;;  %s2024_s19 = sadd.s32 %s2241_s17, %s2240_s14  ;;  %p4125_p4 = scmp.ne.s32.totalorder %s4123_s16, 0 }
  0xe3   : > { %v3269_v26 = vrot.slane %v2236_v16, %v3223_v2  ;;  %v3272_v27 = vrot.slane %v2236_v16, %v3226_v3  ;;  %v3275_v28 = vrot.slane %v2237_v25, %v3223_v2  ;;  %v3278_v29 = vrot.slane %v2237_v25, %v3226_v3  ;;  %s2242_s5 = sshll.u32 %s2024_s19, 6 }
  0xe4   : > { %v486_v30 = vmul.f32 0.0625, %v453_v10  ;;  %v3280_v31 = vfloor.f32 %v485_v11  ;;  %v487_v32 = vmul.f32 0.0625, %v454_v17  ;;  %v488_v33 = vmul.f32 0.0625, %v455_v18  ;;  %s3970_s21 = scalar_lea.hbm %s4124_s9, %s2242_s5  ;;  %p2659_p6 = pnand %p2658_p11, %p4125_p4 }
  0xe5   : > { %v3288_v34 = vmul.f32 0.0625, %v456_v19  ;;  %v3292_v35 = vmul.f32 0.0625, %v457_v20  ;;  %v458_v36 = vcvt.s32.f32 %v3243_v12  ;;  %v459_v37 = vcvt.s32.f32 %v3246_v13 }
  0xe6   : > { %v3296_v38 = vfloor.f32 %v486_v30  ;;  %v549_v39 = vmul.f32 16.0, %v3280_v31  ;;  %v896_v40 = vsub.f32 %v3265_v24, %v3280_v31  ;;  %v895_v41 = vsub.f32 %v3262_v23, %v3280_v31  ;;  %p2660_p0 = pneg %p2659_p6 }
  0xe7   : > { %v1585_v42 = vsub.f32 %v3278_v29, %v3280_v31  ;;  %v1584_v43 = vsub.f32 %v3275_v28, %v3280_v31  ;;  %v3307_v44 = vfloor.f32 %v487_v32  ;;  %v3309_v45 = vfloor.f32 %v488_v33 }
  0xe8   : > { %v550_v46 = vmul.f32 16.0, %v3296_v38  ;;  %v581_v47 = vsub.f32 %v452_v5, %v549_v39  ;;  %v898_v48 = vsub.f32 %v3265_v24, %v3296_v38  ;;  %v960_v49 = vand.u32 2147483647, %v896_v40 }
  0xe9   : > { %v897_v50 = vsub.f32 %v3262_v23, %v3296_v38  ;;  %v959_v51 = vand.u32 2147483647, %v895_v41  ;;  %v1587_v52 = vsub.f32 %v3278_v29, %v3296_v38  ;;  %v1649_v53 = vand.u32 2147483647, %v1585_v42 }
  0xea   : > { %v582_v54 = vsub.f32 %v453_v10, %v550_v46  ;;  %v629_v55 = vsub.f32 %v3259_v22, %v581_v47  ;;  %v962_v56 = vand.u32 2147483647, %v898_v48  ;;  %v1024_v57 = vsub.f32 1.0, %v960_v49 }
  0xeb   : > { %v628_v58 = vsub.f32 %v3256_v21, %v581_v47  ;;  %v961_v59 = vand.u32 2147483647, %v897_v50  ;;  %v1023_v60 = vsub.f32 1.0, %v959_v51  ;;  %v1318_v61 = vsub.f32 %v3272_v27, %v581_v47 }
  0xec   : > { %v631_v62 = vsub.f32 %v3259_v22, %v582_v54  ;;  %v693_v63 = vand.u32 2147483647, %v629_v55  ;;  %v1026_v0 = vsub.f32 1.0, %v962_v56  ;;  %v1088_v4 = vmax.f32 %v1024_v57, 0.0 }
  0xed   : > { %v630_v5 = vsub.f32 %v3256_v21, %v582_v54  ;;  %v692_v11 = vand.u32 2147483647, %v628_v58  ;;  %v1025_v14 = vsub.f32 1.0, %v961_v59  ;;  %v1087_v10 = vmax.f32 %v1023_v60, 0.0 }
  0xee   : > { %v695_v15 = vand.u32 2147483647, %v631_v62  ;;  %v757_v16 = vsub.f32 1.0, %v693_v63  ;;  %v1090_v25 = vmax.f32 %v1026_v0, 0.0  ;;  %v1320_v30 = vsub.f32 %v3272_v27, %v582_v54 }
  0xef   : > { %v694_v31 = vand.u32 2147483647, %v630_v5  ;;  %v756_v32 = vsub.f32 1.0, %v692_v11  ;;  %v1089_v33 = vmax.f32 %v1025_v14, 0.0  ;;  %v1382_v39 = vand.u32 2147483647, %v1318_v61 }
  0xf0   : > { %v759_v40 = vsub.f32 1.0, %v695_v15  ;;  %v821_v41 = vmax.f32 %v757_v16, 0.0  ;;  %v1384_v42 = vand.u32 2147483647, %v1320_v30  ;;  %v1651_v46 = vand.u32 2147483647, %v1587_v52 }
  0xf1   : > { %v758_v48 = vsub.f32 1.0, %v694_v31  ;;  %v820_v49 = vmax.f32 %v756_v32, 0.0  ;;  %v1446_v50 = vsub.f32 1.0, %v1382_v39  ;;  %v1713_v51 = vsub.f32 1.0, %v1649_v53 }
  0xf2   : > { %v823_v55 = vmax.f32 %v759_v40, 0.0  ;;  %v1153_v56 = vmul.f32 %v1088_v4, %v821_v41  ;;  %v1448_v57 = vsub.f32 1.0, %v1384_v42  ;;  %v1715_v58 = vsub.f32 1.0, %v1651_v46 }
  0xf3   : > { %v822_v59 = vmax.f32 %v758_v48, 0.0  ;;  %v1152_v60 = vmul.f32 %v1087_v10, %v820_v49  ;;  %v1510_v62 = vmax.f32 %v1446_v50, 0.0  ;;  %v1777_v63 = vmax.f32 %v1713_v51, 0.0 }
  0xf4   : > { %v1155_v0 = vmul.f32 %v1090_v25, %v823_v55  ;;  %v1512_v5 = vmax.f32 %v1448_v57, 0.0  ;;  %v1779_v11 = vmax.f32 %v1715_v58, 0.0  ;;  %v1317_v61 = vsub.f32 %v3269_v26, %v581_v47 }
  0xf5   : > { %v1154_v14 = vmul.f32 %v1089_v33, %v822_v59  ;;  %v1843_v15 = vmul.f32 %v1777_v63, %v1510_v62  ;;  %v1319_v52 = vsub.f32 %v3269_v26, %v582_v54  ;;  %v1586_v53 = vsub.f32 %v3275_v28, %v3296_v38 }
  0xf6   : > { %v2247_v16 = vpack.c.bf16 %v1155_v0, %v1153_v56  ;;  %v1845_v4 = vmul.f32 %v1779_v11, %v1512_v5  ;;  %v1381_v30 = vand.u32 2147483647, %v1317_v61  ;;  %v1648_v31 = vand.u32 2147483647, %v1584_v43 }
  0xf7   : > { %v2249_v32 = vpack.c.bf16 %v1154_v14, %v1152_v60  ;;  %v1383_v10 = vand.u32 2147483647, %v1319_v52  ;;  %v1650_v39 = vand.u32 2147483647, %v1586_v53  ;;  %v551_v25 = vmul.f32 16.0, %v3307_v44 }
  0xf8   : > { %2248 = vmatprep.subr.bf16.mxu0 %v2247_v16  ;;  %v2311_v40 = vpack.c.bf16 %v1845_v4, %v1843_v15  ;;  %v1445_v41 = vsub.f32 1.0, %v1381_v30  ;;  %v1712_v47 = vsub.f32 1.0, %v1648_v31  ;;  %v552_v33 = vmul.f32 16.0, %v3309_v45 }
  0xf9   : > { %2250 = vmatpush1.bf16.msra.mxu0 %v2249_v32  ;;  %v1447_v54 = vsub.f32 1.0, %v1383_v10  ;;  %v1714_v42 = vsub.f32 1.0, %v1650_v39  ;;  %v3332_v38 = vsub.f32 %v454_v17, %v551_v25  ;;  %v900_v43 = vsub.f32 %v3265_v24, %v3307_v44 }
  0xfa   : > { %2312 = vmatprep.subr.bf16.mxu1 %v2311_v40  ;;  %v1509_v46 = vmax.f32 %v1445_v41, 0.0  ;;  %v1776_v48 = vmax.f32 %v1712_v47, 0.0  ;;  %v584_v49 = vsub.f32 %v455_v18, %v552_v33  ;;  %v902_v50 = vsub.f32 %v3265_v24, %v3309_v45 }
  0xfb   : > { %v1511_v51 = vmax.f32 %v1447_v54, 0.0  ;;  %v1778_v55 = vmax.f32 %v1714_v42, 0.0  ;;  %v633_v56 = vsub.f32 %v3259_v22, %v3332_v38  ;;  %v964_v6 = vand.u32 2147483647, %v900_v43 }
  0xfc   : > { %v1842_v17 = vmul.f32 %v1776_v48, %v1509_v46  ;;  %v635_v57 = vsub.f32 %v3259_v22, %v584_v49  ;;  %v966_v58 = vand.u32 2147483647, %v902_v50  ;;  %v632_v59 = vsub.f32 %v3256_v21, %v3332_v38 }
  0xfd   : > { %v1844_v60 = vmul.f32 %v1778_v55, %v1511_v51  ;;  %v697_v62 = vand.u32 2147483647, %v633_v56  ;;  %v1028_v7 = vsub.f32 1.0, %v964_v6  ;;  %v634_v18 = vsub.f32 %v3256_v21, %v584_v49 }
  0xfe   : > { %v699_v63 = vand.u32 2147483647, %v635_v57  ;;  %v1030_v0 = vsub.f32 1.0, %v966_v58  ;;  %v696_v5 = vand.u32 2147483647, %v632_v59  ;;  %v899_v11 = vsub.f32 %v3262_v23, %v3307_v44 }
  0xff   : > { %v2313_v61 = vpack.c.bf16 %v1844_v60, %v1842_v17  ;;  %v761_v14 = vsub.f32 1.0, %v697_v62  ;;  %v1092_v15 = vmax.f32 %v1028_v7, 0.0  ;;  %v698_v52 = vand.u32 2147483647, %v634_v18 }
 0x100   : > { %v763_v53 = vsub.f32 1.0, %v699_v63  ;;  %v1094_v16 = vmax.f32 %v1030_v0, 0.0  ;;  %v760_v4 = vsub.f32 1.0, %v696_v5  ;;  %v901_v30 = vsub.f32 %v3262_v23, %v3309_v45 }
 0x101   : > { %2314 = vmatpush1.bf16.msra.mxu1 %v2313_v61  ;;  %v825_v31 = vmax.f32 %v761_v14, 0.0  ;;  %v762_v32 = vsub.f32 1.0, %v698_v52  ;;  %v963_v10 = vand.u32 2147483647, %v899_v11  ;;  %v1322_v39 = vsub.f32 %v3272_v27, %v3332_v38 }
 0x102   : > { %v827_v25 = vmax.f32 %v763_v53, 0.0  ;;  %v824_v40 = vmax.f32 %v760_v4, 0.0  ;;  %v965_v41 = vand.u32 2147483647, %v901_v30  ;;  %v1324_v47 = vsub.f32 %v3272_v27, %v584_v49 }
 0x103   : > { %v1157_v33 = vmul.f32 %v1092_v15, %v825_v31  ;;  %v826_v54 = vmax.f32 %v762_v32, 0.0  ;;  %v1027_v42 = vsub.f32 1.0, %v963_v10  ;;  %v1386_v43 = vand.u32 2147483647, %v1322_v39 }
 0x104   : > { %v1159_v46 = vmul.f32 %v1094_v16, %v827_v25  ;;  %v1029_v48 = vsub.f32 1.0, %v965_v41  ;;  %v1388_v50 = vand.u32 2147483647, %v1324_v47  ;;  %v1589_v51 = vsub.f32 %v3278_v29, %v3307_v44 }
 0x105   : > { %v1091_v55 = vmax.f32 %v1027_v42, 0.0  ;;  %v1450_v56 = vsub.f32 1.0, %v1386_v43  ;;  %v1591_v6 = vsub.f32 %v3278_v29, %v3309_v45  ;;  %v1321_v17 = vsub.f32 %v3269_v26, %v3332_v38 }
 0x106   : > { %v2251_v57 = vpack.c.bf16 %v1159_v46, %v1157_v33  ;;  %v1093_v58 = vmax.f32 %v1029_v48, 0.0  ;;  %v1452_v59 = vsub.f32 1.0, %v1388_v50  ;;  %v1653_v60 = vand.u32 2147483647, %v1589_v51 }
 0x107   : > { %v1156_v62 = vmul.f32 %v1091_v55, %v824_v40  ;;  %v1514_v7 = vmax.f32 %v1450_v56, 0.0  ;;  %v1655_v18 = vand.u32 2147483647, %v1591_v6  ;;  %v1323_v63 = vsub.f32 %v3269_v26, %v584_v49 }
 0x108   : > { %2252 = vmatprep.subr.bf16.mxu0 %v2251_v57  ;;  %v1158_v0 = vmul.f32 %v1093_v58, %v826_v54  ;;  %v1516_v5 = vmax.f32 %v1452_v59, 0.0  ;;  %v1717_v11 = vsub.f32 1.0, %v1653_v60  ;;  %v1385_v61 = vand.u32 2147483647, %v1321_v17 }
 0x109   : > { %v1719_v14 = vsub.f32 1.0, %v1655_v18  ;;  %v1387_v15 = vand.u32 2147483647, %v1323_v63  ;;  %v1588_v52 = vsub.f32 %v3275_v28, %v3307_v44  ;;  %v1590_v38 = vsub.f32 %v3275_v28, %v3309_v45 }
 0x10a   : > { %v2253_v53 = vpack.c.bf16 %v1158_v0, %v1156_v62  ;;  %v1781_v16 = vmax.f32 %v1717_v11, 0.0  ;;  %v1449_v4 = vsub.f32 1.0, %v1385_v61  ;;  %v3365_v30 = vfloor.f32 %v3288_v34 }
 0x10b   : > { %v1783_v49 = vmax.f32 %v1719_v14, 0.0  ;;  %v1451_v31 = vsub.f32 1.0, %v1387_v15  ;;  %v1652_v32 = vand.u32 2147483647, %v1588_v52  ;;  %v1654_v10 = vand.u32 2147483647, %v1590_v38 }
 0x10c   : > { %2254 = vmatpush1.bf16.msra.mxu0 %v2253_v53  ;;  %v1847_v39 = vmul.f32 %v1781_v16, %v1514_v7  ;;  %v1513_v25 = vmax.f32 %v1449_v4, 0.0  ;;  %v3368_v40 = vfloor.f32 %v3292_v35  ;;  %v553_v44 = vmul.f32 16.0, %v3365_v30 }
 0x10d   : > { %v1849_v41 = vmul.f32 %v1783_v49, %v1516_v5  ;;  %v1515_v45 = vmax.f32 %v1451_v31, 0.0  ;;  %v1716_v47 = vsub.f32 1.0, %v1652_v32  ;;  %v1718_v33 = vsub.f32 1.0, %v1654_v10 }
 0x10e   : > { %v554_v54 = vmul.f32 16.0, %v3368_v40  ;;  %v3374_v34 = vsub.f32 %v456_v19, %v553_v44  ;;  %v904_v42 = vsub.f32 %v3265_v24, %v3365_v30  ;;  %v906_v43 = vsub.f32 %v3265_v24, %v3368_v40 }
 0x10f   : > { %v2315_v35 = vpack.c.bf16 %v1849_v41, %v1847_v39  ;;  %v1780_v46 = vmax.f32 %v1716_v47, 0.0  ;;  %v1782_v48 = vmax.f32 %v1718_v33, 0.0  ;;  %v903_v50 = vsub.f32 %v3262_v23, %v3365_v30 }
 0x110   : > { %v586_v51 = vsub.f32 %v457_v20, %v554_v54  ;;  %v637_v8 = vsub.f32 %v3259_v22, %v3374_v34  ;;  %v968_v19 = vand.u32 2147483647, %v904_v42  ;;  %v970_v55 = vand.u32 2147483647, %v906_v43 }
 0x111   : > { %2316 = vmatprep.subr.bf16.mxu1 %v2315_v35  ;;  %v1846_v56 = vmul.f32 %v1780_v46, %v1513_v25  ;;  %v1848_v6 = vmul.f32 %v1782_v48, %v1515_v45  ;;  %v636_v17 = vsub.f32 %v3256_v21, %v3374_v34  ;;  %v905_v57 = vsub.f32 %v3262_v23, %v3368_v40 }
 0x112   : > { %v639_v58 = vsub.f32 %v3259_v22, %v586_v51  ;;  %v701_v59 = vand.u32 2147483647, %v637_v8  ;;  %v1032_v60 = vsub.f32 1.0, %v968_v19  ;;  %v1034_v9 = vsub.f32 1.0, %v970_v55 }
 0x113   : > { %v2317_v20 = vpack.c.bf16 %v1848_v6, %v1846_v56  ;;  %v638_v62 = vsub.f32 %v3256_v21, %v586_v51  ;;  %v700_v7 = vand.u32 2147483647, %v636_v17  ;;  %v967_v18 = vand.u32 2147483647, %v903_v50 }
 0x114   : > { %v703_v63 = vand.u32 2147483647, %v639_v58  ;;  %v765_v0 = vsub.f32 1.0, %v701_v59  ;;  %v1096_v5 = vmax.f32 %v1032_v60, 0.0  ;;  %v1098_v11 = vmax.f32 %v1034_v9, 0.0 }
 0x115   : > { %2318 = vmatpush1.bf16.msra.mxu1 %v2317_v20  ;;  %v702_v61 = vand.u32 2147483647, %v638_v62  ;;  %v764_v14 = vsub.f32 1.0, %v700_v7  ;;  %v969_v15 = vand.u32 2147483647, %v905_v57  ;;  %v1031_v52 = vsub.f32 1.0, %v967_v18 }
 0x116   : > { %v767_v38 = vsub.f32 1.0, %v703_v63  ;;  %v829_v53 = vmax.f32 %v765_v0, 0.0  ;;  %v1326_v16 = vsub.f32 %v3272_v27, %v3374_v34  ;;  %v1328_v4 = vsub.f32 %v3272_v27, %v586_v51 }
 0x117   : > { %v766_v49 = vsub.f32 1.0, %v702_v61  ;;  %v828_v31 = vmax.f32 %v764_v14, 0.0  ;;  %v1033_v32 = vsub.f32 1.0, %v969_v15  ;;  %v1095_v10 = vmax.f32 %v1031_v52, 0.0 }
 0x118   : > { %v831_v39 = vmax.f32 %v767_v38, 0.0  ;;  %v1161_v25 = vmul.f32 %v1096_v5, %v829_v53  ;;  %v1390_v44 = vand.u32 2147483647, %v1326_v16  ;;  %v1392_v41 = vand.u32 2147483647, %v1328_v4 }
 0x119   : > { %v830_v45 = vmax.f32 %v766_v49, 0.0  ;;  %v1097_v47 = vmax.f32 %v1033_v32, 0.0  ;;  %v1160_v33 = vmul.f32 %v1095_v10, %v828_v31  ;;  %v1593_v54 = vsub.f32 %v3278_v29, %v3365_v30 }
 0x11a   : > { %v1163_v42 = vmul.f32 %v1098_v11, %v831_v39  ;;  %v1454_v43 = vsub.f32 1.0, %v1390_v44  ;;  %v1456_v35 = vsub.f32 1.0, %v1392_v41  ;;  %v1595_v46 = vsub.f32 %v3278_v29, %v3368_v40 }
 0x11b   : > { %v1162_v48 = vmul.f32 %v1097_v47, %v830_v45  ;;  %v1657_v50 = vand.u32 2147483647, %v1593_v54  ;;  %v1325_v8 = vsub.f32 %v3269_v26, %v3374_v34  ;;  %v1327_v19 = vsub.f32 %v3269_v26, %v586_v51 }
 0x11c   : > { %v2255_v55 = vpack.c.bf16 %v1163_v42, %v1161_v25  ;;  %v1518_v56 = vmax.f32 %v1454_v43, 0.0  ;;  %v1520_v6 = vmax.f32 %v1456_v35, 0.0  ;;  %v1659_v17 = vand.u32 2147483647, %v1595_v46 }
 0x11d   : > { %v2257_v57 = vpack.c.bf16 %v1162_v48, %v1160_v33  ;;  %v1721_v58 = vsub.f32 1.0, %v1657_v50  ;;  %v1389_v59 = vand.u32 2147483647, %v1325_v8  ;;  %v1391_v60 = vand.u32 2147483647, %v1327_v19 }
 0x11e   : > { %2256 = vmatprep.subr.bf16.mxu0 %v2255_v55  ;;  %v1723_v9 = vsub.f32 1.0, %v1659_v17  ;;  %v1592_v20 = vsub.f32 %v3275_v28, %v3365_v30  ;;  %v1594_v62 = vsub.f32 %v3275_v28, %v3368_v40  ;;  %v491_v34 = vmul.f32 0.0625, %v458_v36 }
 0x11f   : > { %2258 = vmatpush1.bf16.msra.mxu0 %v2257_v57  ;;  %v1785_v51 = vmax.f32 %v1721_v58, 0.0  ;;  %v1453_v7 = vsub.f32 1.0, %v1389_v59  ;;  %v1455_v18 = vsub.f32 1.0, %v1391_v60  ;;  %v492_v63 = vmul.f32 0.0625, %v459_v37 }
 0x120   : > { %v1787_v0 = vmax.f32 %v1723_v9, 0.0  ;;  %v1656_v5 = vand.u32 2147483647, %v1592_v20  ;;  %v1658_v11 = vand.u32 2147483647, %v1594_v62  ;;  %v3410_v61 = vfloor.f32 %v491_v34 }
 0x121   : > { %v1851_v14 = vmul.f32 %v1785_v51, %v1518_v56  ;;  %v1517_v30 = vmax.f32 %v1453_v7, 0.0  ;;  %v1519_v15 = vmax.f32 %v1455_v18, 0.0  ;;  %v3412_v52 = vfloor.f32 %v492_v63 }
 0x122   : > { %v1853_v40 = vmul.f32 %v1787_v0, %v1520_v6  ;;  %v1720_v38 = vsub.f32 1.0, %v1656_v5  ;;  %v1722_v53 = vsub.f32 1.0, %v1658_v11  ;;  %v555_v16 = vmul.f32 16.0, %v3410_v61 }
 0x123   : > { %v556_v4 = vmul.f32 16.0, %v3412_v52  ;;  %v908_v49 = vsub.f32 %v3265_v24, %v3410_v61  ;;  %v910_v31 = vsub.f32 %v3265_v24, %v3412_v52  ;;  %v907_v32 = vsub.f32 %v3262_v23, %v3410_v61 }
 0x124   : > { %v2319_v10 = vpack.c.bf16 %v1853_v40, %v1851_v14  ;;  %v1784_v39 = vmax.f32 %v1720_v38, 0.0  ;;  %v1786_v25 = vmax.f32 %v1722_v53, 0.0  ;;  %v587_v44 = vsub.f32 %v458_v36, %v555_v16 }
 0x125   : > { %v588_v41 = vsub.f32 %v459_v37, %v556_v4  ;;  %v972_v45 = vand.u32 2147483647, %v908_v49  ;;  %v974_v47 = vand.u32 2147483647, %v910_v31  ;;  %v909_v33 = vsub.f32 %v3262_v23, %v3412_v52 }
 0x126   : > { %2320 = vmatprep.subr.bf16.mxu1 %v2319_v10  ;;  %v1850_v54 = vmul.f32 %v1784_v39, %v1517_v30  ;;  %v1852_v42 = vmul.f32 %v1786_v25, %v1519_v15  ;;  %v641_v43 = vsub.f32 %v3259_v22, %v587_v44  ;;  %v640_v35 = vsub.f32 %v3256_v21, %v587_v44 }
 0x127   : > { %v643_v46 = vsub.f32 %v3259_v22, %v588_v41  ;;  %v1036_v48 = vsub.f32 1.0, %v972_v45  ;;  %v1038_v12 = vsub.f32 1.0, %v974_v47  ;;  %v642_v36 = vsub.f32 %v3256_v21, %v588_v41 }
 0x128   : > { %v2321_v13 = vpack.c.bf16 %v1852_v42, %v1850_v54  ;;  %v705_v37 = vand.u32 2147483647, %v641_v43  ;;  %v704_v50 = vand.u32 2147483647, %v640_v35  ;;  %v971_v8 = vand.u32 2147483647, %v907_v32 }
 0x129   : > { %v707_v19 = vand.u32 2147483647, %v643_v46  ;;  %v1100_v55 = vmax.f32 %v1036_v48, 0.0  ;;  %v1102_v56 = vmax.f32 %v1038_v12, 0.0  ;;  %v706_v6 = vand.u32 2147483647, %v642_v36 }
 0x12a   : > { %2322 = vmatpush1.bf16.msra.mxu1 %v2321_v13  ;;  %v769_v17 = vsub.f32 1.0, %v705_v37  ;;  %v768_v57 = vsub.f32 1.0, %v704_v50  ;;  %v973_v58 = vand.u32 2147483647, %v909_v33  ;;  %v1035_v59 = vsub.f32 1.0, %v971_v8 }
 0x12b   : > { %v771_v60 = vsub.f32 1.0, %v707_v19  ;;  %v770_v9 = vsub.f32 1.0, %v706_v6  ;;  %v1330_v20 = vsub.f32 %v3272_v27, %v587_v44  ;;  %v1332_v62 = vsub.f32 %v3272_v27, %v588_v41 }
 0x12c   : > { %v833_v34 = vmax.f32 %v769_v17, 0.0  ;;  %v832_v51 = vmax.f32 %v768_v57, 0.0  ;;  %v1037_v7 = vsub.f32 1.0, %v973_v58  ;;  %v1099_v18 = vmax.f32 %v1035_v59, 0.0 }
 0x12d   : > { %v835_v63 = vmax.f32 %v771_v60, 0.0  ;;  %v834_v0 = vmax.f32 %v770_v9, 0.0  ;;  %v1394_v5 = vand.u32 2147483647, %v1330_v20  ;;  %v1396_v11 = vand.u32 2147483647, %v1332_v62 }
 0x12e   : > { %v1165_v14 = vmul.f32 %v1100_v55, %v833_v34  ;;  %v1101_v30 = vmax.f32 %v1037_v7, 0.0  ;;  %v1164_v15 = vmul.f32 %v1099_v18, %v832_v51  ;;  %v1597_v40 = vsub.f32 %v3278_v29, %v3410_v61 }
 0x12f   : > { %v1167_v38 = vmul.f32 %v1102_v56, %v835_v63  ;;  %v1458_v53 = vsub.f32 1.0, %v1394_v5  ;;  %v1460_v16 = vsub.f32 1.0, %v1396_v11  ;;  %v1599_v4 = vsub.f32 %v3278_v29, %v3412_v52 }
 0x130   : > { %v1166_v49 = vmul.f32 %v1101_v30, %v834_v0  ;;  %v1661_v31 = vand.u32 2147483647, %v1597_v40  ;;  %v1329_v32 = vsub.f32 %v3269_v26, %v587_v44  ;;  %v1331_v10 = vsub.f32 %v3269_v26, %v588_v41 }
 0x131   : > { %v2259_v39 = vpack.c.bf16 %v1167_v38, %v1165_v14  ;;  %v1522_v25 = vmax.f32 %v1458_v53, 0.0  ;;  %v1524_v45 = vmax.f32 %v1460_v16, 0.0  ;;  %v1663_v47 = vand.u32 2147483647, %v1599_v4 }
 0x132   : > { %v2261_v33 = vpack.c.bf16 %v1166_v49, %v1164_v15  ;;  %v1725_v54 = vsub.f32 1.0, %v1661_v31  ;;  %v1393_v42 = vand.u32 2147483647, %v1329_v32  ;;  %v1395_v43 = vand.u32 2147483647, %v1331_v10 }
 0x133   : > { %2260 = vmatprep.subr.bf16.mxu0 %v2259_v39  ;;  %v1727_v35 = vsub.f32 1.0, %v1663_v47  ;;  %v1596_v46 = vsub.f32 %v3275_v28, %v3410_v61  ;;  %v1598_v48 = vsub.f32 %v3275_v28, %v3412_v52  ;;  %v428_v44 = vadd.s32 64, %v3220_v1 }
 0x134   : > { %2262 = vmatpush1.bf16.msra.mxu0 %v2261_v33  ;;  %v1789_v41 = vmax.f32 %v1725_v54, 0.0  ;;  %v1457_v12 = vsub.f32 1.0, %v1393_v42  ;;  %v1459_v36 = vsub.f32 1.0, %v1395_v43  ;;  %v429_v13 = vadd.s32 72, %v3220_v1 }
 0x135   : > { %v1791_v37 = vmax.f32 %v1727_v35, 0.0  ;;  %v1660_v50 = vand.u32 2147483647, %v1596_v46  ;;  %v1662_v8 = vand.u32 2147483647, %v1598_v48  ;;  %v460_v19 = vcvt.s32.f32 %v428_v44 }
 0x136   : > { %v1855_v55 = vmul.f32 %v1789_v41, %v1522_v25  ;;  %v1521_v56 = vmax.f32 %v1457_v12, 0.0  ;;  %v1523_v6 = vmax.f32 %v1459_v36, 0.0  ;;  %v461_v17 = vcvt.s32.f32 %v429_v13 }
 0x137   : > { %v1857_v61 = vmul.f32 %v1791_v37, %v1524_v45  ;;  %v1724_v57 = vsub.f32 1.0, %v1660_v50  ;;  %v1726_v58 = vsub.f32 1.0, %v1662_v8  ;;  %v493_v52 = vmul.f32 0.0625, %v460_v19 }
 0x138   : > { %v494_v59 = vmul.f32 0.0625, %v461_v17  ;;  %v3447_v60 = vadd.s32 80, %v3220_v1  ;;  %v3450_v9 = vadd.s32 88, %v3220_v1  ;;  %v3453_v20 = vadd.s32 96, %v3220_v1 }
 0x139   : > { %v2323_v62 = vpack.c.bf16 %v1857_v61, %v1855_v55  ;;  %v1788_v34 = vmax.f32 %v1724_v57, 0.0  ;;  %v1790_v51 = vmax.f32 %v1726_v58, 0.0  ;;  %v3455_v7 = vfloor.f32 %v493_v52 }
 0x13a   : > { %v3457_v18 = vfloor.f32 %v494_v59  ;;  %v462_v63 = vcvt.s32.f32 %v3447_v60  ;;  %v463_v0 = vcvt.s32.f32 %v3450_v9  ;;  %v3462_v5 = vadd.s32 104, %v3220_v1 }
 0x13b   : > { %2324 = vmatprep.subr.bf16.mxu1 %v2323_v62  ;;  %v1854_v11 = vmul.f32 %v1788_v34, %v1521_v56  ;;  %v1856_v14 = vmul.f32 %v1790_v51, %v1523_v6  ;;  %v557_v30 = vmul.f32 16.0, %v3455_v7  ;;  %v912_v15 = vsub.f32 %v3265_v24, %v3455_v7 }
 0x13c   : > { %v558_v40 = vmul.f32 16.0, %v3457_v18  ;;  %v914_v38 = vsub.f32 %v3265_v24, %v3457_v18  ;;  %v911_v53 = vsub.f32 %v3262_v23, %v3455_v7  ;;  %v913_v16 = vsub.f32 %v3262_v23, %v3457_v18 }
 0x13d   : > { %v2325_v4 = vpack.c.bf16 %v1856_v14, %v1854_v11  ;;  %v589_v49 = vsub.f32 %v460_v19, %v557_v30  ;;  %v976_v31 = vand.u32 2147483647, %v912_v15  ;;  %v1601_v32 = vsub.f32 %v3278_v29, %v3455_v7 }
 0x13e   : > { %v590_v10 = vsub.f32 %v461_v17, %v558_v40  ;;  %v978_v39 = vand.u32 2147483647, %v914_v38  ;;  %v975_v25 = vand.u32 2147483647, %v911_v53  ;;  %v977_v45 = vand.u32 2147483647, %v913_v16 }
 0x13f   : > { %2326 = vmatpush1.bf16.msra.mxu1 %v2325_v4  ;;  %v645_v47 = vsub.f32 %v3259_v22, %v589_v49  ;;  %v1040_v33 = vsub.f32 1.0, %v976_v31  ;;  %v644_v54 = vsub.f32 %v3256_v21, %v589_v49  ;;  %v1334_v42 = vsub.f32 %v3272_v27, %v589_v49 }
 0x140   : > { %v647_v43 = vsub.f32 %v3259_v22, %v590_v10  ;;  %v1042_v35 = vsub.f32 1.0, %v978_v39  ;;  %v646_v46 = vsub.f32 %v3256_v21, %v590_v10  ;;  %v1039_v48 = vsub.f32 1.0, %v975_v25 }
 0x141   : > { %v709_v44 = vand.u32 2147483647, %v645_v47  ;;  %v1104_v41 = vmax.f32 %v1040_v33, 0.0  ;;  %v708_v12 = vand.u32 2147483647, %v644_v54  ;;  %v1041_v36 = vsub.f32 1.0, %v977_v45 }
 0x142   : > { %v711_v13 = vand.u32 2147483647, %v647_v43  ;;  %v1106_v37 = vmax.f32 %v1042_v35, 0.0  ;;  %v710_v50 = vand.u32 2147483647, %v646_v46  ;;  %v1103_v8 = vmax.f32 %v1039_v48, 0.0 }
 0x143   : > { %v773_v19 = vsub.f32 1.0, %v709_v44  ;;  %v772_v55 = vsub.f32 1.0, %v708_v12  ;;  %v1105_v56 = vmax.f32 %v1041_v36, 0.0  ;;  %v1336_v6 = vsub.f32 %v3272_v27, %v590_v10 }
 0x144   : > { %v775_v17 = vsub.f32 1.0, %v711_v13  ;;  %v774_v61 = vsub.f32 1.0, %v710_v50  ;;  %v1398_v57 = vand.u32 2147483647, %v1334_v42  ;;  %v1603_v58 = vsub.f32 %v3278_v29, %v3457_v18 }
 0x145   : > { %v837_v52 = vmax.f32 %v773_v19, 0.0  ;;  %v836_v59 = vmax.f32 %v772_v55, 0.0  ;;  %v1400_v62 = vand.u32 2147483647, %v1336_v6  ;;  %v1665_v34 = vand.u32 2147483647, %v1601_v32 }
 0x146   : > { %v839_v51 = vmax.f32 %v775_v17, 0.0  ;;  %v838_v11 = vmax.f32 %v774_v61, 0.0  ;;  %v1462_v14 = vsub.f32 1.0, %v1398_v57  ;;  %v1667_v30 = vand.u32 2147483647, %v1603_v58 }
 0x147   : > { %v1169_v15 = vmul.f32 %v1104_v41, %v837_v52  ;;  %v1168_v40 = vmul.f32 %v1103_v8, %v836_v59  ;;  %v1464_v38 = vsub.f32 1.0, %v1400_v62  ;;  %v1729_v53 = vsub.f32 1.0, %v1665_v34 }
 0x148   : > { %v1171_v16 = vmul.f32 %v1106_v37, %v839_v51  ;;  %v1170_v4 = vmul.f32 %v1105_v56, %v838_v11  ;;  %v1526_v31 = vmax.f32 %v1462_v14, 0.0  ;;  %v1731_v39 = vsub.f32 1.0, %v1667_v30 }
 0x149   : > { %v1528_v25 = vmax.f32 %v1464_v38, 0.0  ;;  %v1793_v45 = vmax.f32 %v1729_v53, 0.0  ;;  %v1333_v47 = vsub.f32 %v3269_v26, %v589_v49  ;;  %v1335_v33 = vsub.f32 %v3269_v26, %v590_v10 }
 0x14a   : > { %v2263_v54 = vpack.c.bf16 %v1171_v16, %v1169_v15  ;;  %v2265_v32 = vpack.c.bf16 %v1170_v4, %v1168_v40  ;;  %v1795_v42 = vmax.f32 %v1731_v39, 0.0  ;;  %v1600_v43 = vsub.f32 %v3275_v28, %v3455_v7 }
 0x14b   : > { %v1859_v35 = vmul.f32 %v1793_v45, %v1526_v31  ;;  %v1397_v46 = vand.u32 2147483647, %v1333_v47  ;;  %v1399_v48 = vand.u32 2147483647, %v1335_v33  ;;  %v1602_v44 = vsub.f32 %v3275_v28, %v3457_v18 }
 0x14c   : > { %2264 = vmatprep.subr.bf16.mxu0 %v2263_v54  ;;  %v1861_v41 = vmul.f32 %v1795_v42, %v1528_v25  ;;  %v1664_v12 = vand.u32 2147483647, %v1600_v43  ;;  %v495_v49 = vmul.f32 0.0625, %v462_v63  ;;  %v496_v10 = vmul.f32 0.0625, %v463_v0 }
 0x14d   : > { %2266 = vmatpush1.bf16.msra.mxu0 %v2265_v32  ;;  %v1461_v36 = vsub.f32 1.0, %v1397_v46  ;;  %v1463_v13 = vsub.f32 1.0, %v1399_v48  ;;  %v1666_v37 = vand.u32 2147483647, %v1602_v44  ;;  %v464_v7 = vcvt.s32.f32 %v3453_v20 }
 0x14e   : > { %v2327_v50 = vpack.c.bf16 %v1861_v41, %v1859_v35  ;;  %v1728_v8 = vsub.f32 1.0, %v1664_v12  ;;  %v3495_v19 = vfloor.f32 %v495_v49  ;;  %v3497_v18 = vfloor.f32 %v496_v10 }
 0x14f   : > { %v1525_v55 = vmax.f32 %v1461_v36, 0.0  ;;  %v1527_v56 = vmax.f32 %v1463_v13, 0.0  ;;  %v1730_v6 = vsub.f32 1.0, %v1666_v37  ;;  %v465_v17 = vcvt.s32.f32 %v3462_v5 }
 0x150   : > { %2328 = vmatprep.subr.bf16.mxu1 %v2327_v50  ;;  %v1792_v61 = vmax.f32 %v1728_v8, 0.0  ;;  %v559_v57 = vmul.f32 16.0, %v3495_v19  ;;  %v560_v58 = vmul.f32 16.0, %v3497_v18  ;;  %v916_v52 = vsub.f32 %v3265_v24, %v3495_v19 }
 0x151   : > { %v1794_v59 = vmax.f32 %v1730_v6, 0.0  ;;  %v918_v62 = vsub.f32 %v3265_v24, %v3497_v18  ;;  %v915_v34 = vsub.f32 %v3262_v23, %v3495_v19  ;;  %v917_v51 = vsub.f32 %v3262_v23, %v3497_v18 }
 0x152   : > { %v1858_v11 = vmul.f32 %v1792_v61, %v1525_v55  ;;  %v591_v14 = vsub.f32 %v462_v63, %v559_v57  ;;  %v592_v30 = vsub.f32 %v463_v0, %v560_v58  ;;  %v980_v15 = vand.u32 2147483647, %v916_v52 }
 0x153   : > { %v1860_v40 = vmul.f32 %v1794_v59, %v1527_v56  ;;  %v982_v38 = vand.u32 2147483647, %v918_v62  ;;  %v979_v53 = vand.u32 2147483647, %v915_v34  ;;  %v981_v16 = vand.u32 2147483647, %v917_v51 }
 0x154   : > { %v649_v4 = vsub.f32 %v3259_v22, %v591_v14  ;;  %v651_v31 = vsub.f32 %v3259_v22, %v592_v30  ;;  %v1044_v39 = vsub.f32 1.0, %v980_v15  ;;  %v648_v25 = vsub.f32 %v3256_v21, %v591_v14 }
 0x155   : > { %v2329_v45 = vpack.c.bf16 %v1860_v40, %v1858_v11  ;;  %v1046_v47 = vsub.f32 1.0, %v982_v38  ;;  %v650_v60 = vsub.f32 %v3256_v21, %v592_v30  ;;  %v1043_v63 = vsub.f32 1.0, %v979_v53 }
 0x156   : > { %v713_v33 = vand.u32 2147483647, %v649_v4  ;;  %v715_v9 = vand.u32 2147483647, %v651_v31  ;;  %v1108_v0 = vmax.f32 %v1044_v39, 0.0  ;;  %v1045_v54 = vsub.f32 1.0, %v981_v16 }
 0x157   : > { %2330 = vmatpush1.bf16.msra.mxu1 %v2329_v45  ;;  %v1110_v32 = vmax.f32 %v1046_v47, 0.0  ;;  %v712_v42 = vand.u32 2147483647, %v648_v25  ;;  %v714_v43 = vand.u32 2147483647, %v650_v60  ;;  %v1107_v35 = vmax.f32 %v1043_v63, 0.0 }
 0x158   : > { %v777_v46 = vsub.f32 1.0, %v713_v33  ;;  %v779_v48 = vsub.f32 1.0, %v715_v9  ;;  %v1109_v44 = vmax.f32 %v1045_v54, 0.0  ;;  %v1338_v41 = vsub.f32 %v3272_v27, %v591_v14 }
 0x159   : > { %v776_v12 = vsub.f32 1.0, %v712_v42  ;;  %v778_v49 = vsub.f32 1.0, %v714_v43  ;;  %v1340_v10 = vsub.f32 %v3272_v27, %v592_v30  ;;  %v1605_v36 = vsub.f32 %v3278_v29, %v3495_v19 }
 0x15a   : > { %v841_v13 = vmax.f32 %v777_v46, 0.0  ;;  %v843_v37 = vmax.f32 %v779_v48, 0.0  ;;  %v1402_v50 = vand.u32 2147483647, %v1338_v41  ;;  %v1607_v8 = vsub.f32 %v3278_v29, %v3497_v18 }
 0x15b   : > { %v840_v55 = vmax.f32 %v776_v12, 0.0  ;;  %v842_v56 = vmax.f32 %v778_v49, 0.0  ;;  %v1404_v6 = vand.u32 2147483647, %v1340_v10  ;;  %v1669_v61 = vand.u32 2147483647, %v1605_v36 }
 0x15c   : > { %v1173_v57 = vmul.f32 %v1108_v0, %v841_v13  ;;  %v1175_v58 = vmul.f32 %v1110_v32, %v843_v37  ;;  %v1466_v52 = vsub.f32 1.0, %v1402_v50  ;;  %v1671_v59 = vand.u32 2147483647, %v1607_v8 }
 0x15d   : > { %v1172_v62 = vmul.f32 %v1107_v35, %v840_v55  ;;  %v1174_v34 = vmul.f32 %v1109_v44, %v842_v56  ;;  %v1468_v51 = vsub.f32 1.0, %v1404_v6  ;;  %v1733_v11 = vsub.f32 1.0, %v1669_v61 }
 0x15e   : > { %v2267_v15 = vpack.c.bf16 %v1175_v58, %v1173_v57  ;;  %v1530_v40 = vmax.f32 %v1466_v52, 0.0  ;;  %v1735_v38 = vsub.f32 1.0, %v1671_v59  ;;  %v1337_v53 = vsub.f32 %v3269_v26, %v591_v14 }
 0x15f   : > { %v2269_v16 = vpack.c.bf16 %v1174_v34, %v1172_v62  ;;  %v1532_v4 = vmax.f32 %v1468_v51, 0.0  ;;  %v1797_v31 = vmax.f32 %v1733_v11, 0.0  ;;  %v1339_v39 = vsub.f32 %v3269_v26, %v592_v30 }
 0x160   : > { %2268 = vmatprep.subr.bf16.mxu0 %v2267_v15  ;;  %v1799_v25 = vmax.f32 %v1735_v38, 0.0  ;;  %v1401_v45 = vand.u32 2147483647, %v1337_v53  ;;  %v1604_v47 = vsub.f32 %v3275_v28, %v3495_v19  ;;  %v1606_v60 = vsub.f32 %v3275_v28, %v3497_v18 }
 0x161   : > { %2270 = vmatpush1.bf16.msra.mxu0 %v2269_v16  ;;  %v1863_v63 = vmul.f32 %v1797_v31, %v1530_v40  ;;  %v1403_v33 = vand.u32 2147483647, %v1339_v39  ;;  %v497_v14 = vmul.f32 0.0625, %v464_v7  ;;  %v498_v9 = vmul.f32 0.0625, %v465_v17 }
 0x162   : > { %v1865_v0 = vmul.f32 %v1799_v25, %v1532_v4  ;;  %v1465_v30 = vsub.f32 1.0, %v1401_v45  ;;  %v1668_v54 = vand.u32 2147483647, %v1604_v47  ;;  %v1670_v32 = vand.u32 2147483647, %v1606_v60 }
 0x163   : > { %v1467_v42 = vsub.f32 1.0, %v1403_v33  ;;  %v3534_v43 = vfloor.f32 %v497_v14  ;;  %v3536_v19 = vfloor.f32 %v498_v9  ;;  %v3539_v18 = vadd.s32 112, %v3220_v1 }
 0x164   : > { %v2331_v35 = vpack.c.bf16 %v1865_v0, %v1863_v63  ;;  %v1529_v46 = vmax.f32 %v1465_v30, 0.0  ;;  %v1732_v48 = vsub.f32 1.0, %v1668_v54  ;;  %v1734_v44 = vsub.f32 1.0, %v1670_v32 }
 0x165   : > { %v1531_v41 = vmax.f32 %v1467_v42, 0.0  ;;  %v561_v12 = vmul.f32 16.0, %v3534_v43  ;;  %v562_v49 = vmul.f32 16.0, %v3536_v19  ;;  %v920_v10 = vsub.f32 %v3265_v24, %v3534_v43 }
 0x166   : > { %2332 = vmatprep.subr.bf16.mxu1 %v2331_v35  ;;  %v1796_v36 = vmax.f32 %v1732_v48, 0.0  ;;  %v1798_v13 = vmax.f32 %v1734_v44, 0.0  ;;  %v922_v37 = vsub.f32 %v3265_v24, %v3536_v19  ;;  %v919_v50 = vsub.f32 %v3262_v23, %v3534_v43 }
 0x167   : > { %v593_v8 = vsub.f32 %v464_v7, %v561_v12  ;;  %v3553_v55 = vsub.f32 %v465_v17, %v562_v49  ;;  %v984_v56 = vand.u32 2147483647, %v920_v10  ;;  %v921_v6 = vsub.f32 %v3262_v23, %v3536_v19 }
 0x168   : > { %v1862_v61 = vmul.f32 %v1796_v36, %v1529_v46  ;;  %v1864_v57 = vmul.f32 %v1798_v13, %v1531_v41  ;;  %v986_v58 = vand.u32 2147483647, %v922_v37  ;;  %v983_v52 = vand.u32 2147483647, %v919_v50 }
 0x169   : > { %v653_v59 = vsub.f32 %v3259_v22, %v593_v8  ;;  %v655_v62 = vsub.f32 %v3259_v22, %v3553_v55  ;;  %v1048_v34 = vsub.f32 1.0, %v984_v56  ;;  %v652_v20 = vsub.f32 %v3256_v21, %v593_v8 }
 0x16a   : > { %v2333_v7 = vpack.c.bf16 %v1864_v57, %v1862_v61  ;;  %v1050_v5 = vsub.f32 1.0, %v986_v58  ;;  %v654_v17 = vsub.f32 %v3256_v21, %v3553_v55  ;;  %v985_v51 = vand.u32 2147483647, %v921_v6 }
 0x16b   : > { %v717_v11 = vand.u32 2147483647, %v653_v59  ;;  %v719_v15 = vand.u32 2147483647, %v655_v62  ;;  %v1112_v40 = vmax.f32 %v1048_v34, 0.0  ;;  %v1047_v38 = vsub.f32 1.0, %v983_v52 }
 0x16c   : > { %2334 = vmatpush1.bf16.msra.mxu1 %v2333_v7  ;;  %v1114_v53 = vmax.f32 %v1050_v5, 0.0  ;;  %v716_v16 = vand.u32 2147483647, %v652_v20  ;;  %v718_v4 = vand.u32 2147483647, %v654_v17  ;;  %v1049_v31 = vsub.f32 1.0, %v985_v51 }
 0x16d   : > { %v781_v39 = vsub.f32 1.0, %v717_v11  ;;  %v783_v25 = vsub.f32 1.0, %v719_v15  ;;  %v1111_v45 = vmax.f32 %v1047_v38, 0.0  ;;  %v1342_v47 = vsub.f32 %v3272_v27, %v593_v8 }
 0x16e   : > { %v780_v60 = vsub.f32 1.0, %v716_v16  ;;  %v782_v63 = vsub.f32 1.0, %v718_v4  ;;  %v1113_v33 = vmax.f32 %v1049_v31, 0.0  ;;  %v1344_v14 = vsub.f32 %v3272_v27, %v3553_v55 }
 0x16f   : > { %v845_v9 = vmax.f32 %v781_v39, 0.0  ;;  %v847_v0 = vmax.f32 %v783_v25, 0.0  ;;  %v1406_v30 = vand.u32 2147483647, %v1342_v47  ;;  %v1609_v54 = vsub.f32 %v3278_v29, %v3534_v43 }
 0x170   : > { %v844_v32 = vmax.f32 %v780_v60, 0.0  ;;  %v846_v42 = vmax.f32 %v782_v63, 0.0  ;;  %v1408_v35 = vand.u32 2147483647, %v1344_v14  ;;  %v1611_v46 = vsub.f32 %v3278_v29, %v3536_v19 }
 0x171   : > { %v1177_v48 = vmul.f32 %v1112_v40, %v845_v9  ;;  %v1179_v44 = vmul.f32 %v1114_v53, %v847_v0  ;;  %v1470_v41 = vsub.f32 1.0, %v1406_v30  ;;  %v1673_v12 = vand.u32 2147483647, %v1609_v54 }
 0x172   : > { %v1176_v49 = vmul.f32 %v1111_v45, %v844_v32  ;;  %v1178_v10 = vmul.f32 %v1113_v33, %v846_v42  ;;  %v1472_v36 = vsub.f32 1.0, %v1408_v35  ;;  %v1675_v13 = vand.u32 2147483647, %v1611_v46 }
 0x173   : > { %v2271_v37 = vpack.c.bf16 %v1179_v44, %v1177_v48  ;;  %v1534_v50 = vmax.f32 %v1470_v41, 0.0  ;;  %v1737_v56 = vsub.f32 1.0, %v1673_v12  ;;  %v1341_v6 = vsub.f32 %v3269_v26, %v593_v8 }
 0x174   : > { %v2273_v61 = vpack.c.bf16 %v1178_v10, %v1176_v49  ;;  %v1536_v57 = vmax.f32 %v1472_v36, 0.0  ;;  %v1739_v58 = vsub.f32 1.0, %v1675_v13  ;;  %v1343_v52 = vsub.f32 %v3269_v26, %v3553_v55 }
 0x175   : > { %2272 = vmatprep.subr.bf16.mxu0 %v2271_v37  ;;  %v1801_v59 = vmax.f32 %v1737_v56, 0.0  ;;  %v1405_v62 = vand.u32 2147483647, %v1341_v6  ;;  %v1608_v34 = vsub.f32 %v3275_v28, %v3534_v43  ;;  %v1610_v20 = vsub.f32 %v3275_v28, %v3536_v19 }
 0x176   : > { %2274 = vmatpush1.bf16.msra.mxu0 %v2273_v61  ;;  %v1803_v7 = vmax.f32 %v1739_v58, 0.0  ;;  %v1407_v5 = vand.u32 2147483647, %v1343_v52  ;;  %v435_v8 = vadd.s32 120, %v3220_v1  ;;  %v466_v17 = vcvt.s32.f32 %v3539_v18 }
 0x177   : > { %v1867_v51 = vmul.f32 %v1801_v59, %v1534_v50  ;;  %v1469_v11 = vsub.f32 1.0, %v1405_v62  ;;  %v1672_v15 = vand.u32 2147483647, %v1608_v34  ;;  %v1674_v55 = vand.u32 2147483647, %v1610_v20 }
 0x178   : > { %v1869_v40 = vmul.f32 %v1803_v7, %v1536_v57  ;;  %v1471_v38 = vsub.f32 1.0, %v1407_v5  ;;  %v467_v53 = vcvt.s32.f32 %v435_v8  ;;  %v499_v16 = vmul.f32 0.0625, %v466_v17 }
 0x179   : > { %v1533_v4 = vmax.f32 %v1469_v11, 0.0  ;;  %v1736_v43 = vsub.f32 1.0, %v1672_v15  ;;  %v1738_v31 = vsub.f32 1.0, %v1674_v55  ;;  %v3580_v19 = vadd.s32 128, %v3220_v1 }
 0x17a   : > { %v2335_v39 = vpack.c.bf16 %v1869_v40, %v1867_v51  ;;  %v1535_v25 = vmax.f32 %v1471_v38, 0.0  ;;  %v500_v45 = vmul.f32 0.0625, %v467_v53  ;;  %v3582_v47 = vfloor.f32 %v499_v16 }
 0x17b   : > { %v1800_v18 = vmax.f32 %v1736_v43, 0.0  ;;  %v1802_v60 = vmax.f32 %v1738_v31, 0.0  ;;  %v3585_v63 = vadd.s32 136, %v3220_v1  ;;  %v468_v33 = vcvt.s32.f32 %v3580_v19 }
 0x17c   : > { %2336 = vmatprep.subr.bf16.mxu1 %v2335_v39  ;;  %v3588_v14 = vfloor.f32 %v500_v45  ;;  %v563_v9 = vmul.f32 16.0, %v3582_v47  ;;  %v924_v0 = vsub.f32 %v3265_v24, %v3582_v47  ;;  %v923_v30 = vsub.f32 %v3262_v23, %v3582_v47 }
 0x17d   : > { %v1866_v54 = vmul.f32 %v1800_v18, %v1533_v4  ;;  %v1868_v32 = vmul.f32 %v1802_v60, %v1535_v25  ;;  %v1613_v42 = vsub.f32 %v3278_v29, %v3582_v47  ;;  %v1612_v35 = vsub.f32 %v3275_v28, %v3582_v47 }
 0x17e   : > { %v564_v46 = vmul.f32 16.0, %v3588_v14  ;;  %v595_v48 = vsub.f32 %v466_v17, %v563_v9  ;;  %v926_v44 = vsub.f32 %v3265_v24, %v3588_v14  ;;  %v988_v41 = vand.u32 2147483647, %v924_v0 }
 0x17f   : > { %v2337_v12 = vpack.c.bf16 %v1868_v32, %v1866_v54  ;;  %v925_v49 = vsub.f32 %v3262_v23, %v3588_v14  ;;  %v987_v10 = vand.u32 2147483647, %v923_v30  ;;  %v1615_v36 = vsub.f32 %v3278_v29, %v3588_v14 }
 0x180   : > { %v596_v13 = vsub.f32 %v467_v53, %v564_v46  ;;  %v657_v37 = vsub.f32 %v3259_v22, %v595_v48  ;;  %v990_v50 = vand.u32 2147483647, %v926_v44  ;;  %v1052_v56 = vsub.f32 1.0, %v988_v41 }
 0x181   : > { %2338 = vmatpush1.bf16.msra.mxu1 %v2337_v12  ;;  %v656_v6 = vsub.f32 %v3256_v21, %v595_v48  ;;  %v989_v61 = vand.u32 2147483647, %v925_v49  ;;  %v1051_v57 = vsub.f32 1.0, %v987_v10  ;;  %v1346_v58 = vsub.f32 %v3272_v27, %v595_v48 }
 0x182   : > { %v659_v52 = vsub.f32 %v3259_v22, %v596_v13  ;;  %v721_v59 = vand.u32 2147483647, %v657_v37  ;;  %v1054_v62 = vsub.f32 1.0, %v990_v50  ;;  %v1116_v34 = vmax.f32 %v1052_v56, 0.0 }
 0x183   : > { %v658_v20 = vsub.f32 %v3256_v21, %v596_v13  ;;  %v720_v7 = vand.u32 2147483647, %v656_v6  ;;  %v1053_v5 = vsub.f32 1.0, %v989_v61  ;;  %v1115_v8 = vmax.f32 %v1051_v57, 0.0 }
 0x184   : > { %v723_v17 = vand.u32 2147483647, %v659_v52  ;;  %v785_v51 = vsub.f32 1.0, %v721_v59  ;;  %v1118_v11 = vmax.f32 %v1054_v62, 0.0  ;;  %v1348_v15 = vsub.f32 %v3272_v27, %v596_v13 }
 0x185   : > { %v722_v55 = vand.u32 2147483647, %v658_v20  ;;  %v784_v40 = vsub.f32 1.0, %v720_v7  ;;  %v1117_v38 = vmax.f32 %v1053_v5, 0.0  ;;  %v1410_v53 = vand.u32 2147483647, %v1346_v58 }
 0x186   : > { %v787_v16 = vsub.f32 1.0, %v723_v17  ;;  %v849_v4 = vmax.f32 %v785_v51, 0.0  ;;  %v1412_v43 = vand.u32 2147483647, %v1348_v15  ;;  %v1677_v31 = vand.u32 2147483647, %v1613_v42 }
 0x187   : > { %v786_v39 = vsub.f32 1.0, %v722_v55  ;;  %v848_v25 = vmax.f32 %v784_v40, 0.0  ;;  %v1474_v45 = vsub.f32 1.0, %v1410_v53  ;;  %v1679_v47 = vand.u32 2147483647, %v1615_v36 }
 0x188   : > { %v851_v18 = vmax.f32 %v787_v16, 0.0  ;;  %v1181_v60 = vmul.f32 %v1116_v34, %v849_v4  ;;  %v1476_v9 = vsub.f32 1.0, %v1412_v43  ;;  %v1741_v0 = vsub.f32 1.0, %v1677_v31 }
 0x189   : > { %v850_v30 = vmax.f32 %v786_v39, 0.0  ;;  %v1180_v54 = vmul.f32 %v1115_v8, %v848_v25  ;;  %v1538_v32 = vmax.f32 %v1474_v45, 0.0  ;;  %v1743_v46 = vsub.f32 1.0, %v1679_v47 }
 0x18a   : > { %v1183_v44 = vmul.f32 %v1118_v11, %v851_v18  ;;  %v1540_v41 = vmax.f32 %v1476_v9, 0.0  ;;  %v1805_v12 = vmax.f32 %v1741_v0, 0.0  ;;  %v1345_v49 = vsub.f32 %v3269_v26, %v595_v48 }
 0x18b   : > { %v1182_v10 = vmul.f32 %v1117_v38, %v850_v30  ;;  %v1807_v37 = vmax.f32 %v1743_v46, 0.0  ;;  %v1347_v42 = vsub.f32 %v3269_v26, %v596_v13  ;;  %v1614_v36 = vsub.f32 %v3275_v28, %v3588_v14 }
 0x18c   : > { %v2275_v50 = vpack.c.bf16 %v1183_v44, %v1181_v60  ;;  %v1871_v56 = vmul.f32 %v1805_v12, %v1538_v32  ;;  %v1409_v6 = vand.u32 2147483647, %v1345_v49  ;;  %v1676_v61 = vand.u32 2147483647, %v1612_v35 }
 0x18d   : > { %v2277_v57 = vpack.c.bf16 %v1182_v10, %v1180_v54  ;;  %v1873_v58 = vmul.f32 %v1807_v37, %v1540_v41  ;;  %v1411_v52 = vand.u32 2147483647, %v1347_v42  ;;  %v1678_v59 = vand.u32 2147483647, %v1614_v36 }
 0x18e   : > { %2276 = vmatprep.subr.bf16.mxu0 %v2275_v50  ;;  %v1473_v62 = vsub.f32 1.0, %v1409_v6  ;;  %v1740_v34 = vsub.f32 1.0, %v1676_v61  ;;  %v469_v48 = vcvt.s32.f32 %v3585_v63  ;;  %v501_v20 = vmul.f32 0.0625, %v468_v33 }
 0x18f   : > { %2278 = vmatpush1.bf16.msra.mxu0 %v2277_v57  ;;  %v2339_v13 = vpack.c.bf16 %v1873_v58, %v1871_v56  ;;  %v1475_v7 = vsub.f32 1.0, %v1411_v52  ;;  %v1742_v14 = vsub.f32 1.0, %v1678_v59  ;;  %v3620_v5 = vadd.s32 144, %v3220_v1 }
 0x190   : > { %v1537_v35 = vmax.f32 %v1473_v62, 0.0  ;;  %v1804_v8 = vmax.f32 %v1740_v34, 0.0  ;;  %v502_v17 = vmul.f32 0.0625, %v469_v48  ;;  %v3622_v51 = vfloor.f32 %v501_v20 }
 0x191   : > { %2340 = vmatprep.subr.bf16.mxu1 %v2339_v13  ;;  %v1539_v11 = vmax.f32 %v1475_v7, 0.0  ;;  %v1806_v15 = vmax.f32 %v1742_v14, 0.0  ;;  %v3625_v63 = vadd.s32 152, %v3220_v1  ;;  %v470_v55 = vcvt.s32.f32 %v3620_v5 }
 0x192   : > { %v1870_v40 = vmul.f32 %v1804_v8, %v1537_v35  ;;  %v3628_v38 = vfloor.f32 %v502_v17  ;;  %v565_v53 = vmul.f32 16.0, %v3622_v51  ;;  %v928_v16 = vsub.f32 %v3265_v24, %v3622_v51 }
 0x193   : > { %v1872_v4 = vmul.f32 %v1806_v15, %v1539_v11  ;;  %v927_v43 = vsub.f32 %v3262_v23, %v3622_v51  ;;  %v1617_v31 = vsub.f32 %v3278_v29, %v3622_v51  ;;  %v1616_v39 = vsub.f32 %v3275_v28, %v3622_v51 }
 0x194   : > { %v566_v25 = vmul.f32 16.0, %v3628_v38  ;;  %v597_v45 = vsub.f32 %v468_v33, %v565_v53  ;;  %v930_v47 = vsub.f32 %v3265_v24, %v3628_v38  ;;  %v992_v18 = vand.u32 2147483647, %v928_v16 }
 0x195   : > { %v2341_v60 = vpack.c.bf16 %v1872_v4, %v1870_v40  ;;  %v929_v9 = vsub.f32 %v3262_v23, %v3628_v38  ;;  %v991_v0 = vand.u32 2147483647, %v927_v43  ;;  %v1619_v30 = vsub.f32 %v3278_v29, %v3628_v38 }
 0x196   : > { %v598_v54 = vsub.f32 %v469_v48, %v566_v25  ;;  %v661_v32 = vsub.f32 %v3259_v22, %v597_v45  ;;  %v994_v46 = vand.u32 2147483647, %v930_v47  ;;  %v1056_v44 = vsub.f32 1.0, %v992_v18 }
 0x197   : > { %2342 = vmatpush1.bf16.msra.mxu1 %v2341_v60  ;;  %v660_v19 = vsub.f32 %v3256_v21, %v597_v45  ;;  %v993_v33 = vand.u32 2147483647, %v929_v9  ;;  %v1055_v41 = vsub.f32 1.0, %v991_v0  ;;  %v1350_v12 = vsub.f32 %v3272_v27, %v597_v45 }
 0x198   : > { %v663_v49 = vsub.f32 %v3259_v22, %v598_v54  ;;  %v725_v10 = vand.u32 2147483647, %v661_v32  ;;  %v1058_v37 = vsub.f32 1.0, %v994_v46  ;;  %v1120_v42 = vmax.f32 %v1056_v44, 0.0 }
 0x199   : > { %v662_v36 = vsub.f32 %v3256_v21, %v598_v54  ;;  %v724_v50 = vand.u32 2147483647, %v660_v19  ;;  %v1057_v56 = vsub.f32 1.0, %v993_v33  ;;  %v1119_v6 = vmax.f32 %v1055_v41, 0.0 }
 0x19a   : > { %v727_v61 = vand.u32 2147483647, %v663_v49  ;;  %v789_v57 = vsub.f32 1.0, %v725_v10  ;;  %v1122_v58 = vmax.f32 %v1058_v37, 0.0  ;;  %v1352_v52 = vsub.f32 %v3272_v27, %v598_v54 }
 0x19b   : > { %v726_v59 = vand.u32 2147483647, %v662_v36  ;;  %v788_v62 = vsub.f32 1.0, %v724_v50  ;;  %v1121_v34 = vmax.f32 %v1057_v56, 0.0  ;;  %v1414_v48 = vand.u32 2147483647, %v1350_v12 }
 0x19c   : > { %v791_v20 = vsub.f32 1.0, %v727_v61  ;;  %v853_v13 = vmax.f32 %v789_v57, 0.0  ;;  %v1416_v7 = vand.u32 2147483647, %v1352_v52  ;;  %v1681_v14 = vand.u32 2147483647, %v1617_v31 }
 0x19d   : > { %v790_v35 = vsub.f32 1.0, %v726_v59  ;;  %v852_v8 = vmax.f32 %v788_v62, 0.0  ;;  %v1478_v17 = vsub.f32 1.0, %v1414_v48  ;;  %v1683_v51 = vand.u32 2147483647, %v1619_v30 }
 0x19e   : > { %v855_v11 = vmax.f32 %v791_v20, 0.0  ;;  %v1185_v15 = vmul.f32 %v1120_v42, %v853_v13  ;;  %v1480_v40 = vsub.f32 1.0, %v1416_v7  ;;  %v1745_v53 = vsub.f32 1.0, %v1681_v14 }
 0x19f   : > { %v854_v16 = vmax.f32 %v790_v35, 0.0  ;;  %v1184_v4 = vmul.f32 %v1119_v6, %v852_v8  ;;  %v1542_v43 = vmax.f32 %v1478_v17, 0.0  ;;  %v1747_v25 = vsub.f32 1.0, %v1683_v51 }
 0x1a0   : > { %v1187_v47 = vmul.f32 %v1122_v58, %v855_v11  ;;  %v1544_v18 = vmax.f32 %v1480_v40, 0.0  ;;  %v1809_v60 = vmax.f32 %v1745_v53, 0.0  ;;  %v1349_v9 = vsub.f32 %v3269_v26, %v597_v45 }
 0x1a1   : > { %v1186_v0 = vmul.f32 %v1121_v34, %v854_v16  ;;  %v1811_v32 = vmax.f32 %v1747_v25, 0.0  ;;  %v1351_v31 = vsub.f32 %v3269_v26, %v598_v54  ;;  %v1618_v30 = vsub.f32 %v3275_v28, %v3628_v38 }
 0x1a2   : > { %v2279_v46 = vpack.c.bf16 %v1187_v47, %v1185_v15  ;;  %v1875_v44 = vmul.f32 %v1809_v60, %v1542_v43  ;;  %v1413_v19 = vand.u32 2147483647, %v1349_v9  ;;  %v1680_v33 = vand.u32 2147483647, %v1616_v39 }
 0x1a3   : > { %v2281_v41 = vpack.c.bf16 %v1186_v0, %v1184_v4  ;;  %v1877_v12 = vmul.f32 %v1811_v32, %v1544_v18  ;;  %v1415_v49 = vand.u32 2147483647, %v1351_v31  ;;  %v1682_v10 = vand.u32 2147483647, %v1618_v30 }
 0x1a4   : > { %2280 = vmatprep.subr.bf16.mxu0 %v2279_v46  ;;  %v1477_v37 = vsub.f32 1.0, %v1413_v19  ;;  %v1744_v42 = vsub.f32 1.0, %v1680_v33  ;;  %v471_v45 = vcvt.s32.f32 %v3625_v63  ;;  %v503_v36 = vmul.f32 0.0625, %v470_v55 }
 0x1a5   : > { %2282 = vmatpush1.bf16.msra.mxu0 %v2281_v41  ;;  %v2343_v54 = vpack.c.bf16 %v1877_v12, %v1875_v44  ;;  %v1479_v50 = vsub.f32 1.0, %v1415_v49  ;;  %v1746_v38 = vsub.f32 1.0, %v1682_v10  ;;  %v3662_v56 = vadd.s32 160, %v3220_v1 }
 0x1a6   : > { %v1541_v39 = vmax.f32 %v1477_v37, 0.0  ;;  %v1808_v6 = vmax.f32 %v1744_v42, 0.0  ;;  %v504_v61 = vmul.f32 0.0625, %v471_v45  ;;  %v3664_v57 = vfloor.f32 %v503_v36 }
 0x1a7   : > { %2344 = vmatprep.subr.bf16.mxu1 %v2343_v54  ;;  %v1543_v58 = vmax.f32 %v1479_v50, 0.0  ;;  %v1810_v52 = vmax.f32 %v1746_v38, 0.0  ;;  %v3667_v63 = vadd.s32 168, %v3220_v1  ;;  %v472_v59 = vcvt.s32.f32 %v3662_v56 }
 0x1a8   : > { %v1874_v62 = vmul.f32 %v1808_v6, %v1541_v39  ;;  %v3670_v34 = vfloor.f32 %v504_v61  ;;  %v567_v48 = vmul.f32 16.0, %v3664_v57  ;;  %v932_v20 = vsub.f32 %v3265_v24, %v3664_v57 }
 0x1a9   : > { %v1876_v13 = vmul.f32 %v1810_v52, %v1543_v58  ;;  %v931_v7 = vsub.f32 %v3262_v23, %v3664_v57  ;;  %v1621_v14 = vsub.f32 %v3278_v29, %v3664_v57  ;;  %v1620_v35 = vsub.f32 %v3275_v28, %v3664_v57 }
 0x1aa   : > { %v568_v8 = vmul.f32 16.0, %v3670_v34  ;;  %v599_v17 = vsub.f32 %v470_v55, %v567_v48  ;;  %v934_v51 = vsub.f32 %v3265_v24, %v3670_v34  ;;  %v996_v11 = vand.u32 2147483647, %v932_v20 }
 0x1ab   : > { %v2345_v15 = vpack.c.bf16 %v1876_v13, %v1874_v62  ;;  %v933_v40 = vsub.f32 %v3262_v23, %v3670_v34  ;;  %v995_v53 = vand.u32 2147483647, %v931_v7  ;;  %v1623_v16 = vsub.f32 %v3278_v29, %v3670_v34 }
 0x1ac   : > { %v600_v4 = vsub.f32 %v471_v45, %v568_v8  ;;  %v665_v43 = vsub.f32 %v3259_v22, %v599_v17  ;;  %v998_v25 = vand.u32 2147483647, %v934_v51  ;;  %v1060_v47 = vsub.f32 1.0, %v996_v11 }
 0x1ad   : > { %2346 = vmatpush1.bf16.msra.mxu1 %v2345_v15  ;;  %v664_v5 = vsub.f32 %v3256_v21, %v599_v17  ;;  %v997_v55 = vand.u32 2147483647, %v933_v40  ;;  %v1059_v18 = vsub.f32 1.0, %v995_v53  ;;  %v1354_v60 = vsub.f32 %v3272_v27, %v599_v17 }
 0x1ae   : > { %v667_v9 = vsub.f32 %v3259_v22, %v600_v4  ;;  %v729_v0 = vand.u32 2147483647, %v665_v43  ;;  %v1062_v32 = vsub.f32 1.0, %v998_v25  ;;  %v1124_v31 = vmax.f32 %v1060_v47, 0.0 }
 0x1af   : > { %v666_v30 = vsub.f32 %v3256_v21, %v600_v4  ;;  %v728_v46 = vand.u32 2147483647, %v664_v5  ;;  %v1061_v44 = vsub.f32 1.0, %v997_v55  ;;  %v1123_v19 = vmax.f32 %v1059_v18, 0.0 }
 0x1b0   : > { %v731_v33 = vand.u32 2147483647, %v667_v9  ;;  %v793_v41 = vsub.f32 1.0, %v729_v0  ;;  %v1126_v12 = vmax.f32 %v1062_v32, 0.0  ;;  %v1356_v49 = vsub.f32 %v3272_v27, %v600_v4 }
 0x1b1   : > { %v730_v10 = vand.u32 2147483647, %v666_v30  ;;  %v792_v37 = vsub.f32 1.0, %v728_v46  ;;  %v1125_v42 = vmax.f32 %v1061_v44, 0.0  ;;  %v1418_v45 = vand.u32 2147483647, %v1354_v60 }
 0x1b2   : > { %v795_v36 = vsub.f32 1.0, %v731_v33  ;;  %v857_v54 = vmax.f32 %v793_v41, 0.0  ;;  %v1420_v50 = vand.u32 2147483647, %v1356_v49  ;;  %v1685_v38 = vand.u32 2147483647, %v1621_v14 }
 0x1b3   : > { %v794_v39 = vsub.f32 1.0, %v730_v10  ;;  %v856_v6 = vmax.f32 %v792_v37, 0.0  ;;  %v1482_v61 = vsub.f32 1.0, %v1418_v45  ;;  %v1687_v57 = vand.u32 2147483647, %v1623_v16 }
 0x1b4   : > { %v859_v58 = vmax.f32 %v795_v36, 0.0  ;;  %v1189_v52 = vmul.f32 %v1124_v31, %v857_v54  ;;  %v1484_v62 = vsub.f32 1.0, %v1420_v50  ;;  %v1749_v48 = vsub.f32 1.0, %v1685_v38 }
 0x1b5   : > { %v858_v20 = vmax.f32 %v794_v39, 0.0  ;;  %v1188_v13 = vmul.f32 %v1123_v19, %v856_v6  ;;  %v1546_v7 = vmax.f32 %v1482_v61, 0.0  ;;  %v1751_v8 = vsub.f32 1.0, %v1687_v57 }
 0x1b6   : > { %v1191_v51 = vmul.f32 %v1126_v12, %v859_v58  ;;  %v1548_v11 = vmax.f32 %v1484_v62, 0.0  ;;  %v1813_v15 = vmax.f32 %v1749_v48, 0.0  ;;  %v1353_v40 = vsub.f32 %v3269_v26, %v599_v17 }
 0x1b7   : > { %v1190_v53 = vmul.f32 %v1125_v42, %v858_v20  ;;  %v1815_v43 = vmax.f32 %v1751_v8, 0.0  ;;  %v1355_v14 = vsub.f32 %v3269_v26, %v600_v4  ;;  %v1622_v16 = vsub.f32 %v3275_v28, %v3670_v34 }
 0x1b8   : > { %v2283_v25 = vpack.c.bf16 %v1191_v51, %v1189_v52  ;;  %v1879_v47 = vmul.f32 %v1813_v15, %v1546_v7  ;;  %v1417_v5 = vand.u32 2147483647, %v1353_v40  ;;  %v1684_v55 = vand.u32 2147483647, %v1620_v35 }
 0x1b9   : > { %v2285_v18 = vpack.c.bf16 %v1190_v53, %v1188_v13  ;;  %v1881_v60 = vmul.f32 %v1815_v43, %v1548_v11  ;;  %v1419_v9 = vand.u32 2147483647, %v1355_v14  ;;  %v1686_v0 = vand.u32 2147483647, %v1622_v16 }
 0x1ba   : > { %2284 = vmatprep.subr.bf16.mxu0 %v2283_v25  ;;  %v1481_v32 = vsub.f32 1.0, %v1417_v5  ;;  %v1748_v31 = vsub.f32 1.0, %v1684_v55  ;;  %v473_v17 = vcvt.s32.f32 %v3667_v63  ;;  %v505_v30 = vmul.f32 0.0625, %v472_v59 }
 0x1bb   : > { %2286 = vmatpush1.bf16.msra.mxu0 %v2285_v18  ;;  %v2347_v4 = vpack.c.bf16 %v1881_v60, %v1879_v47  ;;  %v1483_v46 = vsub.f32 1.0, %v1419_v9  ;;  %v1750_v34 = vsub.f32 1.0, %v1686_v0  ;;  %v3704_v44 = vadd.s32 176, %v3220_v1 }
 0x1bc   : > { %v1545_v35 = vmax.f32 %v1481_v32, 0.0  ;;  %v1812_v19 = vmax.f32 %v1748_v31, 0.0  ;;  %v506_v33 = vmul.f32 0.0625, %v473_v17  ;;  %v3706_v41 = vfloor.f32 %v505_v30 }
 0x1bd   : > { %2348 = vmatprep.subr.bf16.mxu1 %v2347_v4  ;;  %v1547_v12 = vmax.f32 %v1483_v46, 0.0  ;;  %v1814_v49 = vmax.f32 %v1750_v34, 0.0  ;;  %v3709_v63 = vadd.s32 184, %v3220_v1  ;;  %v474_v10 = vcvt.s32.f32 %v3704_v44 }
 0x1be   : > { %v1878_v37 = vmul.f32 %v1812_v19, %v1545_v35  ;;  %v3712_v42 = vfloor.f32 %v506_v33  ;;  %v569_v45 = vmul.f32 16.0, %v3706_v41  ;;  %v936_v36 = vsub.f32 %v3265_v24, %v3706_v41 }
 0x1bf   : > { %v1880_v54 = vmul.f32 %v1814_v49, %v1547_v12  ;;  %v935_v50 = vsub.f32 %v3262_v23, %v3706_v41  ;;  %v1625_v38 = vsub.f32 %v3278_v29, %v3706_v41  ;;  %v1624_v39 = vsub.f32 %v3275_v28, %v3706_v41 }
 0x1c0   : > { %v570_v6 = vmul.f32 16.0, %v3712_v42  ;;  %v601_v61 = vsub.f32 %v472_v59, %v569_v45  ;;  %v938_v57 = vsub.f32 %v3265_v24, %v3712_v42  ;;  %v1000_v58 = vand.u32 2147483647, %v936_v36 }
 0x1c1   : > { %v2349_v52 = vpack.c.bf16 %v1880_v54, %v1878_v37  ;;  %v937_v62 = vsub.f32 %v3262_v23, %v3712_v42  ;;  %v999_v48 = vand.u32 2147483647, %v935_v50  ;;  %v1627_v20 = vsub.f32 %v3278_v29, %v3712_v42 }
 0x1c2   : > { %v602_v13 = vsub.f32 %v473_v17, %v570_v6  ;;  %v669_v7 = vsub.f32 %v3259_v22, %v601_v61  ;;  %v1002_v8 = vand.u32 2147483647, %v938_v57  ;;  %v1064_v51 = vsub.f32 1.0, %v1000_v58 }
 0x1c3   : > { %2350 = vmatpush1.bf16.msra.mxu1 %v2349_v52  ;;  %v668_v56 = vsub.f32 %v3256_v21, %v601_v61  ;;  %v1001_v59 = vand.u32 2147483647, %v937_v62  ;;  %v1063_v11 = vsub.f32 1.0, %v999_v48  ;;  %v1358_v15 = vsub.f32 %v3272_v27, %v601_v61 }
 0x1c4   : > { %v671_v40 = vsub.f32 %v3259_v22, %v602_v13  ;;  %v733_v53 = vand.u32 2147483647, %v669_v7  ;;  %v1066_v43 = vsub.f32 1.0, %v1002_v8  ;;  %v1128_v14 = vmax.f32 %v1064_v51, 0.0 }
 0x1c5   : > { %v670_v16 = vsub.f32 %v3256_v21, %v602_v13  ;;  %v732_v25 = vand.u32 2147483647, %v668_v56  ;;  %v1065_v47 = vsub.f32 1.0, %v1001_v59  ;;  %v1127_v5 = vmax.f32 %v1063_v11, 0.0 }
 0x1c6   : > { %v735_v55 = vand.u32 2147483647, %v671_v40  ;;  %v797_v18 = vsub.f32 1.0, %v733_v53  ;;  %v1130_v60 = vmax.f32 %v1066_v43, 0.0  ;;  %v1360_v9 = vsub.f32 %v3272_v27, %v602_v13 }
 0x1c7   : > { %v734_v0 = vand.u32 2147483647, %v670_v16  ;;  %v796_v32 = vsub.f32 1.0, %v732_v25  ;;  %v1129_v31 = vmax.f32 %v1065_v47, 0.0  ;;  %v1422_v17 = vand.u32 2147483647, %v1358_v15 }
 0x1c8   : > { %v799_v30 = vsub.f32 1.0, %v735_v55  ;;  %v861_v4 = vmax.f32 %v797_v18, 0.0  ;;  %v1424_v46 = vand.u32 2147483647, %v1360_v9  ;;  %v1689_v34 = vand.u32 2147483647, %v1625_v38 }
 0x1c9   : > { %v798_v35 = vsub.f32 1.0, %v734_v0  ;;  %v860_v19 = vmax.f32 %v796_v32, 0.0  ;;  %v1486_v33 = vsub.f32 1.0, %v1422_v17  ;;  %v1691_v41 = vand.u32 2147483647, %v1627_v20 }
 0x1ca   : > { %v863_v12 = vmax.f32 %v799_v30, 0.0  ;;  %v1193_v49 = vmul.f32 %v1128_v14, %v861_v4  ;;  %v1488_v37 = vsub.f32 1.0, %v1424_v46  ;;  %v1753_v45 = vsub.f32 1.0, %v1689_v34 }
 0x1cb   : > { %v862_v36 = vmax.f32 %v798_v35, 0.0  ;;  %v1192_v54 = vmul.f32 %v1127_v5, %v860_v19  ;;  %v1550_v50 = vmax.f32 %v1486_v33, 0.0  ;;  %v1755_v6 = vsub.f32 1.0, %v1691_v41 }
 0x1cc   : > { %v1195_v57 = vmul.f32 %v1130_v60, %v863_v12  ;;  %v1552_v58 = vmax.f32 %v1488_v37, 0.0  ;;  %v1817_v52 = vmax.f32 %v1753_v45, 0.0  ;;  %v1357_v62 = vsub.f32 %v3269_v26, %v601_v61 }
 0x1cd   : > { %v1194_v48 = vmul.f32 %v1129_v31, %v862_v36  ;;  %v1819_v7 = vmax.f32 %v1755_v6, 0.0  ;;  %v1359_v38 = vsub.f32 %v3269_v26, %v602_v13  ;;  %v1626_v20 = vsub.f32 %v3275_v28, %v3712_v42 }
 0x1ce   : > { %v2287_v8 = vpack.c.bf16 %v1195_v57, %v1193_v49  ;;  %v1883_v51 = vmul.f32 %v1817_v52, %v1550_v50  ;;  %v1421_v56 = vand.u32 2147483647, %v1357_v62  ;;  %v1688_v59 = vand.u32 2147483647, %v1624_v39 }
 0x1cf   : > { %v2289_v11 = vpack.c.bf16 %v1194_v48, %v1192_v54  ;;  %v1885_v15 = vmul.f32 %v1819_v7, %v1552_v58  ;;  %v1423_v40 = vand.u32 2147483647, %v1359_v38  ;;  %v1690_v53 = vand.u32 2147483647, %v1626_v20 }
 0x1d0   : > { %2288 = vmatprep.subr.bf16.mxu0 %v2287_v8  ;;  %v1485_v43 = vsub.f32 1.0, %v1421_v56  ;;  %v1752_v14 = vsub.f32 1.0, %v1688_v59  ;;  %v475_v61 = vcvt.s32.f32 %v3709_v63  ;;  %v507_v16 = vmul.f32 0.0625, %v474_v10 }
 0x1d1   : > { %2290 = vmatpush1.bf16.msra.mxu0 %v2289_v11  ;;  %v2351_v13 = vpack.c.bf16 %v1885_v15, %v1883_v51  ;;  %v1487_v25 = vsub.f32 1.0, %v1423_v40  ;;  %v1754_v42 = vsub.f32 1.0, %v1690_v53  ;;  %v3746_v47 = vadd.s32 192, %v3220_v1 }
 0x1d2   : > { %v1549_v39 = vmax.f32 %v1485_v43, 0.0  ;;  %v1816_v5 = vmax.f32 %v1752_v14, 0.0  ;;  %v508_v55 = vmul.f32 0.0625, %v475_v61  ;;  %v3748_v18 = vfloor.f32 %v507_v16 }
 0x1d3   : > { %2352 = vmatprep.subr.bf16.mxu1 %v2351_v13  ;;  %v1551_v60 = vmax.f32 %v1487_v25, 0.0  ;;  %v1818_v9 = vmax.f32 %v1754_v42, 0.0  ;;  %v3751_v63 = vadd.s32 200, %v3220_v1  ;;  %v476_v0 = vcvt.s32.f32 %v3746_v47 }
 0x1d4   : > { %v1882_v32 = vmul.f32 %v1816_v5, %v1549_v39  ;;  %v3754_v31 = vfloor.f32 %v508_v55  ;;  %v571_v17 = vmul.f32 16.0, %v3748_v18  ;;  %v940_v30 = vsub.f32 %v3265_v24, %v3748_v18 }
 0x1d5   : > { %v1884_v4 = vmul.f32 %v1818_v9, %v1551_v60  ;;  %v939_v46 = vsub.f32 %v3262_v23, %v3748_v18  ;;  %v1629_v34 = vsub.f32 %v3278_v29, %v3748_v18  ;;  %v1628_v35 = vsub.f32 %v3275_v28, %v3748_v18 }
 0x1d6   : > { %v572_v19 = vmul.f32 16.0, %v3754_v31  ;;  %v603_v33 = vsub.f32 %v474_v10, %v571_v17  ;;  %v942_v41 = vsub.f32 %v3265_v24, %v3754_v31  ;;  %v1004_v12 = vand.u32 2147483647, %v940_v30 }
 0x1d7   : > { %v2353_v49 = vpack.c.bf16 %v1884_v4, %v1882_v32  ;;  %v941_v37 = vsub.f32 %v3262_v23, %v3754_v31  ;;  %v1003_v45 = vand.u32 2147483647, %v939_v46  ;;  %v1631_v36 = vsub.f32 %v3278_v29, %v3754_v31 }
 0x1d8   : > { %v604_v54 = vsub.f32 %v475_v61, %v572_v19  ;;  %v673_v50 = vsub.f32 %v3259_v22, %v603_v33  ;;  %v1006_v6 = vand.u32 2147483647, %v942_v41  ;;  %v1068_v57 = vsub.f32 1.0, %v1004_v12 }
 0x1d9   : > { %2354 = vmatpush1.bf16.msra.mxu1 %v2353_v49  ;;  %v672_v44 = vsub.f32 %v3256_v21, %v603_v33  ;;  %v1005_v10 = vand.u32 2147483647, %v941_v37  ;;  %v1067_v58 = vsub.f32 1.0, %v1003_v45  ;;  %v1362_v52 = vsub.f32 %v3272_v27, %v603_v33 }
 0x1da   : > { %v675_v62 = vsub.f32 %v3259_v22, %v604_v54  ;;  %v737_v48 = vand.u32 2147483647, %v673_v50  ;;  %v1070_v7 = vsub.f32 1.0, %v1006_v6  ;;  %v1132_v38 = vmax.f32 %v1068_v57, 0.0 }
 0x1db   : > { %v674_v20 = vsub.f32 %v3256_v21, %v604_v54  ;;  %v736_v8 = vand.u32 2147483647, %v672_v44  ;;  %v1069_v51 = vsub.f32 1.0, %v1005_v10  ;;  %v1131_v56 = vmax.f32 %v1067_v58, 0.0 }
 0x1dc   : > { %v739_v59 = vand.u32 2147483647, %v675_v62  ;;  %v801_v11 = vsub.f32 1.0, %v737_v48  ;;  %v1134_v15 = vmax.f32 %v1070_v7, 0.0  ;;  %v1364_v40 = vsub.f32 %v3272_v27, %v604_v54 }
 0x1dd   : > { %v738_v53 = vand.u32 2147483647, %v674_v20  ;;  %v800_v43 = vsub.f32 1.0, %v736_v8  ;;  %v1133_v14 = vmax.f32 %v1069_v51, 0.0  ;;  %v1426_v61 = vand.u32 2147483647, %v1362_v52 }
 0x1de   : > { %v803_v16 = vsub.f32 1.0, %v739_v59  ;;  %v865_v13 = vmax.f32 %v801_v11, 0.0  ;;  %v1428_v25 = vand.u32 2147483647, %v1364_v40  ;;  %v1693_v42 = vand.u32 2147483647, %v1629_v34 }
 0x1df   : > { %v802_v39 = vsub.f32 1.0, %v738_v53  ;;  %v864_v5 = vmax.f32 %v800_v43, 0.0  ;;  %v1490_v55 = vsub.f32 1.0, %v1426_v61  ;;  %v1695_v18 = vand.u32 2147483647, %v1631_v36 }
 0x1e0   : > { %v867_v60 = vmax.f32 %v803_v16, 0.0  ;;  %v1197_v9 = vmul.f32 %v1132_v38, %v865_v13  ;;  %v1492_v32 = vsub.f32 1.0, %v1428_v25  ;;  %v1757_v17 = vsub.f32 1.0, %v1693_v42 }
 0x1e1   : > { %v866_v30 = vmax.f32 %v802_v39, 0.0  ;;  %v1196_v4 = vmul.f32 %v1131_v56, %v864_v5  ;;  %v1554_v46 = vmax.f32 %v1490_v55, 0.0  ;;  %v1759_v19 = vsub.f32 1.0, %v1695_v18 }
 0x1e2   : > { %v1199_v41 = vmul.f32 %v1134_v15, %v867_v60  ;;  %v1556_v12 = vmax.f32 %v1492_v32, 0.0  ;;  %v1821_v49 = vmax.f32 %v1757_v17, 0.0  ;;  %v1361_v37 = vsub.f32 %v3269_v26, %v603_v33 }
 0x1e3   : > { %v1198_v45 = vmul.f32 %v1133_v14, %v866_v30  ;;  %v1823_v50 = vmax.f32 %v1759_v19, 0.0  ;;  %v1363_v34 = vsub.f32 %v3269_v26, %v604_v54  ;;  %v1630_v36 = vsub.f32 %v3275_v28, %v3754_v31 }
 0x1e4   : > { %v2291_v6 = vpack.c.bf16 %v1199_v41, %v1197_v9  ;;  %v1887_v57 = vmul.f32 %v1821_v49, %v1554_v46  ;;  %v1425_v44 = vand.u32 2147483647, %v1361_v37  ;;  %v1692_v10 = vand.u32 2147483647, %v1628_v35 }
 0x1e5   : > { %v2293_v58 = vpack.c.bf16 %v1198_v45, %v1196_v4  ;;  %v1889_v52 = vmul.f32 %v1823_v50, %v1556_v12  ;;  %v1427_v62 = vand.u32 2147483647, %v1363_v34  ;;  %v1694_v48 = vand.u32 2147483647, %v1630_v36 }
 0x1e6   : > { %2292 = vmatprep.subr.bf16.mxu0 %v2291_v6  ;;  %v1489_v7 = vsub.f32 1.0, %v1425_v44  ;;  %v1756_v38 = vsub.f32 1.0, %v1692_v10  ;;  %v477_v33 = vcvt.s32.f32 %v3751_v63  ;;  %v509_v20 = vmul.f32 0.0625, %v476_v0 }
 0x1e7   : > { %2294 = vmatpush1.bf16.msra.mxu0 %v2293_v58  ;;  %v2355_v54 = vpack.c.bf16 %v1889_v52, %v1887_v57  ;;  %v1491_v8 = vsub.f32 1.0, %v1427_v62  ;;  %v1758_v31 = vsub.f32 1.0, %v1694_v48  ;;  %v3788_v51 = vadd.s32 208, %v3220_v1 }
 0x1e8   : > { %v1553_v35 = vmax.f32 %v1489_v7, 0.0  ;;  %v1820_v56 = vmax.f32 %v1756_v38, 0.0  ;;  %v510_v59 = vmul.f32 0.0625, %v477_v33  ;;  %v3790_v11 = vfloor.f32 %v509_v20 }
 0x1e9   : > { %2356 = vmatprep.subr.bf16.mxu1 %v2355_v54  ;;  %v1555_v15 = vmax.f32 %v1491_v8, 0.0  ;;  %v1822_v40 = vmax.f32 %v1758_v31, 0.0  ;;  %v3793_v63 = vadd.s32 216, %v3220_v1  ;;  %v478_v53 = vcvt.s32.f32 %v3788_v51 }
 0x1ea   : > { %v1886_v43 = vmul.f32 %v1820_v56, %v1553_v35  ;;  %v3796_v14 = vfloor.f32 %v510_v59  ;;  %v573_v61 = vmul.f32 16.0, %v3790_v11  ;;  %v944_v16 = vsub.f32 %v3265_v24, %v3790_v11 }
 0x1eb   : > { %v1888_v13 = vmul.f32 %v1822_v40, %v1555_v15  ;;  %v943_v25 = vsub.f32 %v3262_v23, %v3790_v11  ;;  %v1633_v42 = vsub.f32 %v3278_v29, %v3790_v11  ;;  %v1632_v39 = vsub.f32 %v3275_v28, %v3790_v11 }
 0x1ec   : > { %v574_v5 = vmul.f32 16.0, %v3796_v14  ;;  %v605_v55 = vsub.f32 %v476_v0, %v573_v61  ;;  %v946_v18 = vsub.f32 %v3265_v24, %v3796_v14  ;;  %v1008_v60 = vand.u32 2147483647, %v944_v16 }
 0x1ed   : > { %v2357_v9 = vpack.c.bf16 %v1888_v13, %v1886_v43  ;;  %v945_v32 = vsub.f32 %v3262_v23, %v3796_v14  ;;  %v1007_v17 = vand.u32 2147483647, %v943_v25  ;;  %v1635_v30 = vsub.f32 %v3278_v29, %v3796_v14 }
 0x1ee   : > { %v606_v4 = vsub.f32 %v477_v33, %v574_v5  ;;  %v677_v46 = vsub.f32 %v3259_v22, %v605_v55  ;;  %v1010_v19 = vand.u32 2147483647, %v946_v18  ;;  %v1072_v41 = vsub.f32 1.0, %v1008_v60 }
 0x1ef   : > { %2358 = vmatpush1.bf16.msra.mxu1 %v2357_v9  ;;  %v676_v47 = vsub.f32 %v3256_v21, %v605_v55  ;;  %v1009_v0 = vand.u32 2147483647, %v945_v32  ;;  %v1071_v12 = vsub.f32 1.0, %v1007_v17  ;;  %v1366_v49 = vsub.f32 %v3272_v27, %v605_v55 }
 0x1f0   : > { %v679_v37 = vsub.f32 %v3259_v22, %v606_v4  ;;  %v741_v45 = vand.u32 2147483647, %v677_v46  ;;  %v1074_v50 = vsub.f32 1.0, %v1010_v19  ;;  %v1136_v34 = vmax.f32 %v1072_v41, 0.0 }
 0x1f1   : > { %v678_v36 = vsub.f32 %v3256_v21, %v606_v4  ;;  %v740_v6 = vand.u32 2147483647, %v676_v47  ;;  %v1073_v57 = vsub.f32 1.0, %v1009_v0  ;;  %v1135_v44 = vmax.f32 %v1071_v12, 0.0 }
 0x1f2   : > { %v743_v10 = vand.u32 2147483647, %v679_v37  ;;  %v805_v58 = vsub.f32 1.0, %v741_v45  ;;  %v1138_v52 = vmax.f32 %v1074_v50, 0.0  ;;  %v1368_v62 = vsub.f32 %v3272_v27, %v606_v4 }
 0x1f3   : > { %v742_v48 = vand.u32 2147483647, %v678_v36  ;;  %v804_v7 = vsub.f32 1.0, %v740_v6  ;;  %v1137_v38 = vmax.f32 %v1073_v57, 0.0  ;;  %v1430_v33 = vand.u32 2147483647, %v1366_v49 }
 0x1f4   : > { %v807_v20 = vsub.f32 1.0, %v743_v10  ;;  %v869_v54 = vmax.f32 %v805_v58, 0.0  ;;  %v1432_v8 = vand.u32 2147483647, %v1368_v62  ;;  %v1697_v31 = vand.u32 2147483647, %v1633_v42 }
 0x1f5   : > { %v806_v35 = vsub.f32 1.0, %v742_v48  ;;  %v868_v56 = vmax.f32 %v804_v7, 0.0  ;;  %v1494_v59 = vsub.f32 1.0, %v1430_v33  ;;  %v1699_v11 = vand.u32 2147483647, %v1635_v30 }
 0x1f6   : > { %v871_v15 = vmax.f32 %v807_v20, 0.0  ;;  %v1201_v40 = vmul.f32 %v1136_v34, %v869_v54  ;;  %v1496_v43 = vsub.f32 1.0, %v1432_v8  ;;  %v1761_v61 = vsub.f32 1.0, %v1697_v31 }
 0x1f7   : > { %v870_v16 = vmax.f32 %v806_v35, 0.0  ;;  %v1200_v13 = vmul.f32 %v1135_v44, %v868_v56  ;;  %v1558_v25 = vmax.f32 %v1494_v59, 0.0  ;;  %v1763_v5 = vsub.f32 1.0, %v1699_v11 }
 0x1f8   : > { %v1203_v18 = vmul.f32 %v1138_v52, %v871_v15  ;;  %v1560_v60 = vmax.f32 %v1496_v43, 0.0  ;;  %v1825_v9 = vmax.f32 %v1761_v61, 0.0  ;;  %v1365_v32 = vsub.f32 %v3269_v26, %v605_v55 }
 0x1f9   : > { %v1202_v17 = vmul.f32 %v1137_v38, %v870_v16  ;;  %v1827_v46 = vmax.f32 %v1763_v5, 0.0  ;;  %v1367_v42 = vsub.f32 %v3269_v26, %v606_v4  ;;  %v1634_v30 = vsub.f32 %v3275_v28, %v3796_v14 }
 0x1fa   : > { %v2295_v19 = vpack.c.bf16 %v1203_v18, %v1201_v40  ;;  %v1891_v41 = vmul.f32 %v1825_v9, %v1558_v25  ;;  %v1429_v47 = vand.u32 2147483647, %v1365_v32  ;;  %v1696_v0 = vand.u32 2147483647, %v1632_v39 }
 0x1fb   : > { %v2297_v12 = vpack.c.bf16 %v1202_v17, %v1200_v13  ;;  %v1893_v49 = vmul.f32 %v1827_v46, %v1560_v60  ;;  %v1431_v37 = vand.u32 2147483647, %v1367_v42  ;;  %v1698_v45 = vand.u32 2147483647, %v1634_v30 }
 0x1fc   : > { %2296 = vmatprep.subr.bf16.mxu0 %v2295_v19  ;;  %v1493_v50 = vsub.f32 1.0, %v1429_v47  ;;  %v1760_v34 = vsub.f32 1.0, %v1696_v0  ;;  %v479_v55 = vcvt.s32.f32 %v3793_v63  ;;  %v511_v36 = vmul.f32 0.0625, %v478_v53 }
 0x1fd   : > { %2298 = vmatpush1.bf16.msra.mxu0 %v2297_v12  ;;  %v2359_v4 = vpack.c.bf16 %v1893_v49, %v1891_v41  ;;  %v1495_v6 = vsub.f32 1.0, %v1431_v37  ;;  %v1762_v14 = vsub.f32 1.0, %v1698_v45  ;;  %v3830_v57 = vadd.s32 224, %v3220_v1 }
 0x1fe   : > { %v1557_v39 = vmax.f32 %v1493_v50, 0.0  ;;  %v1824_v44 = vmax.f32 %v1760_v34, 0.0  ;;  %v512_v10 = vmul.f32 0.0625, %v479_v55  ;;  %v3832_v58 = vfloor.f32 %v511_v36 }
 0x1ff   : > { %2360 = vmatprep.subr.bf16.mxu1 %v2359_v4  ;;  %v1559_v52 = vmax.f32 %v1495_v6, 0.0  ;;  %v1826_v62 = vmax.f32 %v1762_v14, 0.0  ;;  %v3835_v63 = vadd.s32 232, %v3220_v1  ;;  %v480_v48 = vcvt.s32.f32 %v3830_v57 }
 0x200   : > { %v1890_v7 = vmul.f32 %v1824_v44, %v1557_v39  ;;  %v3838_v38 = vfloor.f32 %v512_v10  ;;  %v575_v33 = vmul.f32 16.0, %v3832_v58  ;;  %v948_v20 = vsub.f32 %v3265_v24, %v3832_v58 }
 0x201   : > { %v1892_v54 = vmul.f32 %v1826_v62, %v1559_v52  ;;  %v947_v8 = vsub.f32 %v3262_v23, %v3832_v58  ;;  %v1637_v31 = vsub.f32 %v3278_v29, %v3832_v58  ;;  %v1636_v35 = vsub.f32 %v3275_v28, %v3832_v58 }
 0x202   : > { %v576_v56 = vmul.f32 16.0, %v3838_v38  ;;  %v607_v59 = vsub.f32 %v478_v53, %v575_v33  ;;  %v950_v11 = vsub.f32 %v3265_v24, %v3838_v38  ;;  %v1012_v15 = vand.u32 2147483647, %v948_v20 }
 0x203   : > { %v2361_v40 = vpack.c.bf16 %v1892_v54, %v1890_v7  ;;  %v949_v43 = vsub.f32 %v3262_v23, %v3838_v38  ;;  %v1011_v61 = vand.u32 2147483647, %v947_v8  ;;  %v1639_v16 = vsub.f32 %v3278_v29, %v3838_v38 }
 0x204   : > { %v608_v13 = vsub.f32 %v479_v55, %v576_v56  ;;  %v681_v25 = vsub.f32 %v3259_v22, %v607_v59  ;;  %v1014_v5 = vand.u32 2147483647, %v950_v11  ;;  %v1076_v18 = vsub.f32 1.0, %v1012_v15 }
 0x205   : > { %2362 = vmatpush1.bf16.msra.mxu1 %v2361_v40  ;;  %v680_v51 = vsub.f32 %v3256_v21, %v607_v59  ;;  %v1013_v53 = vand.u32 2147483647, %v949_v43  ;;  %v1075_v60 = vsub.f32 1.0, %v1011_v61  ;;  %v1370_v9 = vsub.f32 %v3272_v27, %v607_v59 }
 0x206   : > { %v683_v32 = vsub.f32 %v3259_v22, %v608_v13  ;;  %v745_v17 = vand.u32 2147483647, %v681_v25  ;;  %v1078_v46 = vsub.f32 1.0, %v1014_v5  ;;  %v1140_v42 = vmax.f32 %v1076_v18, 0.0 }
 0x207   : > { %v682_v30 = vsub.f32 %v3256_v21, %v608_v13  ;;  %v744_v19 = vand.u32 2147483647, %v680_v51  ;;  %v1077_v41 = vsub.f32 1.0, %v1013_v53  ;;  %v1139_v47 = vmax.f32 %v1075_v60, 0.0 }
 0x208   : > { %v747_v0 = vand.u32 2147483647, %v683_v32  ;;  %v809_v12 = vsub.f32 1.0, %v745_v17  ;;  %v1142_v49 = vmax.f32 %v1078_v46, 0.0  ;;  %v1372_v37 = vsub.f32 %v3272_v27, %v608_v13 }
 0x209   : > { %v746_v45 = vand.u32 2147483647, %v682_v30  ;;  %v808_v50 = vsub.f32 1.0, %v744_v19  ;;  %v1141_v34 = vmax.f32 %v1077_v41, 0.0  ;;  %v1434_v55 = vand.u32 2147483647, %v1370_v9 }
 0x20a   : > { %v811_v36 = vsub.f32 1.0, %v747_v0  ;;  %v873_v4 = vmax.f32 %v809_v12, 0.0  ;;  %v1436_v6 = vand.u32 2147483647, %v1372_v37  ;;  %v1701_v14 = vand.u32 2147483647, %v1637_v31 }
 0x20b   : > { %v810_v39 = vsub.f32 1.0, %v746_v45  ;;  %v872_v44 = vmax.f32 %v808_v50, 0.0  ;;  %v1498_v10 = vsub.f32 1.0, %v1434_v55  ;;  %v1703_v58 = vand.u32 2147483647, %v1639_v16 }
 0x20c   : > { %v875_v52 = vmax.f32 %v811_v36, 0.0  ;;  %v1205_v62 = vmul.f32 %v1140_v42, %v873_v4  ;;  %v1500_v7 = vsub.f32 1.0, %v1436_v6  ;;  %v1765_v33 = vsub.f32 1.0, %v1701_v14 }
 0x20d   : > { %v874_v20 = vmax.f32 %v810_v39, 0.0  ;;  %v1204_v54 = vmul.f32 %v1139_v47, %v872_v44  ;;  %v1562_v8 = vmax.f32 %v1498_v10, 0.0  ;;  %v1767_v56 = vsub.f32 1.0, %v1703_v58 }
 0x20e   : > { %v1207_v11 = vmul.f32 %v1142_v49, %v875_v52  ;;  %v1564_v15 = vmax.f32 %v1500_v7, 0.0  ;;  %v1829_v40 = vmax.f32 %v1765_v33, 0.0  ;;  %v1369_v43 = vsub.f32 %v3269_v26, %v607_v59 }
 0x20f   : > { %v1206_v61 = vmul.f32 %v1141_v34, %v874_v20  ;;  %v1831_v25 = vmax.f32 %v1767_v56, 0.0  ;;  %v1371_v31 = vsub.f32 %v3269_v26, %v608_v13  ;;  %v1638_v16 = vsub.f32 %v3275_v28, %v3838_v38 }
 0x210   : > { %v2299_v5 = vpack.c.bf16 %v1207_v11, %v1205_v62  ;;  %v1895_v18 = vmul.f32 %v1829_v40, %v1562_v8  ;;  %v1433_v51 = vand.u32 2147483647, %v1369_v43  ;;  %v1700_v53 = vand.u32 2147483647, %v1636_v35 }
 0x211   : > { %v2301_v60 = vpack.c.bf16 %v1206_v61, %v1204_v54  ;;  %v1897_v9 = vmul.f32 %v1831_v25, %v1564_v15  ;;  %v1435_v32 = vand.u32 2147483647, %v1371_v31  ;;  %v1702_v17 = vand.u32 2147483647, %v1638_v16 }
 0x212   : > { %2300 = vmatprep.subr.bf16.mxu0 %v2299_v5  ;;  %v1497_v46 = vsub.f32 1.0, %v1433_v51  ;;  %v1764_v42 = vsub.f32 1.0, %v1700_v53  ;;  %v481_v59 = vcvt.s32.f32 %v3835_v63  ;;  %v513_v30 = vmul.f32 0.0625, %v480_v48 }
 0x213   : > { %2302 = vmatpush1.bf16.msra.mxu0 %v2301_v60  ;;  %v2363_v13 = vpack.c.bf16 %v1897_v9, %v1895_v18  ;;  %v1499_v19 = vsub.f32 1.0, %v1435_v32  ;;  %v1766_v38 = vsub.f32 1.0, %v1702_v17  ;;  %v3872_v41 = vadd.s32 240, %v3220_v1 }
 0x214   : > { %v1561_v35 = vmax.f32 %v1497_v46, 0.0  ;;  %v1828_v47 = vmax.f32 %v1764_v42, 0.0  ;;  %v514_v0 = vmul.f32 0.0625, %v481_v59  ;;  %v3874_v12 = vfloor.f32 %v513_v30 }
 0x215   : > { %2364 = vmatprep.subr.bf16.mxu1 %v2363_v13  ;;  %v1563_v49 = vmax.f32 %v1499_v19, 0.0  ;;  %v1830_v37 = vmax.f32 %v1766_v38, 0.0  ;;  %v3877_v63 = vadd.s32 248, %v3220_v1  ;;  %v482_v45 = vcvt.s32.f32 %v3872_v41 }
 0x216   : > { %v1894_v50 = vmul.f32 %v1828_v47, %v1561_v35  ;;  %v3880_v34 = vfloor.f32 %v514_v0  ;;  %v577_v55 = vmul.f32 16.0, %v3874_v12  ;;  %v952_v36 = vsub.f32 %v3265_v24, %v3874_v12 }
 0x217   : > { %v1896_v4 = vmul.f32 %v1830_v37, %v1563_v49  ;;  %v951_v6 = vsub.f32 %v3262_v23, %v3874_v12  ;;  %v1641_v14 = vsub.f32 %v3278_v29, %v3874_v12  ;;  %v1640_v1 = vsub.f32 %v3275_v28, %v3874_v12 }
 0x218   : > { %v578_v39 = vmul.f32 16.0, %v3880_v34  ;;  %v609_v44 = vsub.f32 %v480_v48, %v577_v55  ;;  %v954_v10 = vsub.f32 %v3265_v24, %v3880_v34  ;;  %v1016_v58 = vand.u32 2147483647, %v952_v36 }
 0x219   : > { %v2365_v52 = vpack.c.bf16 %v1896_v4, %v1894_v50  ;;  %v953_v62 = vsub.f32 %v3262_v23, %v3880_v34  ;;  %v1015_v7 = vand.u32 2147483647, %v951_v6  ;;  %v1643_v33 = vsub.f32 %v3278_v29, %v3880_v34 }
 0x21a   : > { %v610_v20 = vsub.f32 %v481_v59, %v578_v39  ;;  %v685_v54 = vsub.f32 %v3259_v22, %v609_v44  ;;  %v1018_v8 = vand.u32 2147483647, %v954_v10  ;;  %v1080_v56 = vsub.f32 1.0, %v1016_v58 }
 0x21b   : > { %2366 = vmatpush1.bf16.msra.mxu1 %v2365_v52  ;;  %v684_v57 = vsub.f32 %v3256_v21, %v609_v44  ;;  %v1017_v48 = vand.u32 2147483647, %v953_v62  ;;  %v1079_v11 = vsub.f32 1.0, %v1015_v7  ;;  %v1374_v15 = vsub.f32 %v3272_v27, %v609_v44 }
 0x21c   : > { %v687_v40 = vsub.f32 %v3259_v22, %v610_v20  ;;  %v749_v43 = vand.u32 2147483647, %v685_v54  ;;  %v1082_v61 = vsub.f32 1.0, %v1018_v8  ;;  %v1144_v25 = vmax.f32 %v1080_v56, 0.0 }
 0x21d   : > { %v686_v31 = vsub.f32 %v3256_v21, %v610_v20  ;;  %v748_v16 = vand.u32 2147483647, %v684_v57  ;;  %v1081_v5 = vsub.f32 1.0, %v1017_v48  ;;  %v1143_v18 = vmax.f32 %v1079_v11, 0.0  ;;  %v3912_v48 = vld [vmem:[%s363_s7] sm:$0xff] }
 0x21e   : > { %v751_v51 = vand.u32 2147483647, %v687_v40  ;;  %v813_v53 = vsub.f32 1.0, %v749_v43  ;;  %v1146_v60 = vmax.f32 %v1082_v61, 0.0  ;;  %v1376_v9 = vsub.f32 %v3272_v27, %v610_v20 }
 0x21f   : > { %v750_v32 = vand.u32 2147483647, %v686_v31  ;;  %v812_v17 = vsub.f32 1.0, %v748_v16  ;;  %v1145_v46 = vmax.f32 %v1081_v5, 0.0  ;;  %v1438_v42 = vand.u32 2147483647, %v1374_v15 }
 0x220   : > { %v815_v59 = vsub.f32 1.0, %v751_v51  ;;  %v877_v30 = vmax.f32 %v813_v53, 0.0  ;;  %v1440_v13 = vand.u32 2147483647, %v1376_v9  ;;  %v1705_v19 = vand.u32 2147483647, %v1641_v14 }
 0x221   : > { %v814_v38 = vsub.f32 1.0, %v750_v32  ;;  %v876_v35 = vmax.f32 %v812_v17, 0.0  ;;  %v1502_v47 = vsub.f32 1.0, %v1438_v42  ;;  %v1707_v0 = vand.u32 2147483647, %v1643_v33 }
 0x222   : > { %v879_v12 = vmax.f32 %v815_v59, 0.0  ;;  %v1209_v49 = vmul.f32 %v1144_v25, %v877_v30  ;;  %v1504_v37 = vsub.f32 1.0, %v1440_v13  ;;  %v1769_v50 = vsub.f32 1.0, %v1705_v19 }
 0x223   : > { %v878_v55 = vmax.f32 %v814_v38, 0.0  ;;  %v1208_v36 = vmul.f32 %v1143_v18, %v876_v35  ;;  %v1566_v4 = vmax.f32 %v1502_v47, 0.0  ;;  %v1771_v6 = vsub.f32 1.0, %v1707_v0 }
 0x224   : > { %v1211_v39 = vmul.f32 %v1146_v60, %v879_v12  ;;  %v1568_v10 = vmax.f32 %v1504_v37, 0.0  ;;  %v1833_v58 = vmax.f32 %v1769_v50, 0.0  ;;  %v1373_v52 = vsub.f32 %v3269_v26, %v609_v44 }
 0x225   : > { %v1210_v62 = vmul.f32 %v1145_v46, %v878_v55  ;;  %v1835_v14 = vmax.f32 %v1771_v6, 0.0  ;;  %v1375_v7 = vsub.f32 %v3269_v26, %v610_v20  ;;  %v1642_v33 = vsub.f32 %v3275_v28, %v3880_v34  ;;  %v3919_v34 = vld [vmem:[%s363_s7 + $0x8] sm:$0xff] }
 0x226   : > { %v2303_v54 = vpack.c.bf16 %v1211_v39, %v1209_v49  ;;  %v1899_v8 = vmul.f32 %v1833_v58, %v1566_v4  ;;  %v1437_v56 = vand.u32 2147483647, %v1373_v52  ;;  %v1704_v57 = vand.u32 2147483647, %v1640_v1 }
 0x227   : > { %v2305_v11 = vpack.c.bf16 %v1210_v62, %v1208_v36  ;;  %v1901_v15 = vmul.f32 %v1835_v14, %v1568_v10  ;;  %v1439_v40 = vand.u32 2147483647, %v1375_v7  ;;  %v1706_v43 = vand.u32 2147483647, %v1642_v33 }
 0x228   : > { %2304 = vmatprep.subr.bf16.mxu0 %v2303_v54  ;;  %v1501_v44 = vsub.f32 1.0, %v1437_v56  ;;  %v1768_v61 = vsub.f32 1.0, %v1704_v57  ;;  %v483_v20 = vcvt.s32.f32 %v3877_v63  ;;  %v515_v25 = vmul.f32 0.0625, %v482_v45 }
 0x229   : > { %2306 = vmatpush1.bf16.msra.mxu0 %v2305_v11  ;;  %v2367_v1 = vpack.c.bf16 %v1901_v15, %v1899_v8  ;;  %v1503_v31 = vsub.f32 1.0, %v1439_v40  ;;  %v1770_v16 = vsub.f32 1.0, %v1706_v43  ;;  %v1217_v5 = vcombine.high %v3912_v48, %v3912_v48 }
 0x22a   : > { %v1565_v18 = vmax.f32 %v1501_v44, 0.0  ;;  %v1832_v51 = vmax.f32 %v1768_v61, 0.0  ;;  %v516_v53 = vmul.f32 0.0625, %v483_v20  ;;  %v3923_v60 = vfloor.f32 %v515_v25 }
 0x22b   : > { %2368 = vmatprep.subr.bf16.mxu1 %v2367_v1  ;;  %v1567_v63 = vmax.f32 %v1503_v31, 0.0  ;;  %v1834_v9 = vmax.f32 %v1770_v16, 0.0  ;;  %1283 = vmatprep.mubr.f32.mxu0 %v1217_v5  ;;  %v1907_v32 = vcombine.high %v3919_v34, %v3919_v34 }
 0x22c   : > { %v1898_v17 = vmul.f32 %v1832_v51, %v1565_v18  ;;  %v3927_v46 = vfloor.f32 %v516_v53  ;;  %v579_v42 = vmul.f32 16.0, %v3923_v60  ;;  %v956_v59 = vsub.f32 %v3265_v24, %v3923_v60 }
 0x22d   : > { %v1900_v30 = vmul.f32 %v1834_v9, %v1567_v63  ;;  %v955_v13 = vsub.f32 %v3262_v23, %v3923_v60  ;;  %v1645_v19 = vsub.f32 %v3278_v29, %v3923_v60  ;;  %v1644_v38 = vsub.f32 %v3275_v28, %v3923_v60  ;;  %1973 = vmatprep.mubr.f32.mxu1 %v1907_v32 }
 0x22e   : > { %v580_v35 = vmul.f32 16.0, %v3927_v46  ;;  %v611_v47 = vsub.f32 %v482_v45, %v579_v42  ;;  %v958_v0 = vsub.f32 %v3265_v24, %v3927_v46  ;;  %v1020_v12 = vand.u32 2147483647, %v956_v59 }
 0x22f   : > { %v2369_v49 = vpack.c.bf16 %v1900_v30, %v1898_v17  ;;  %v957_v37 = vsub.f32 %v3262_v23, %v3927_v46  ;;  %v1019_v50 = vand.u32 2147483647, %v955_v13  ;;  %v1647_v55 = vsub.f32 %v3278_v29, %v3927_v46 }
 0x230   : > { %v612_v36 = vsub.f32 %v483_v20, %v580_v35  ;;  %v689_v4 = vsub.f32 %v3259_v22, %v611_v47  ;;  %v1022_v6 = vand.u32 2147483647, %v958_v0  ;;  %v1084_v39 = vsub.f32 1.0, %v1020_v12 }
 0x231   : > { %2370 = vmatpush1.bf16.msra.mxu1 %v2369_v49  ;;  %v688_v41 = vsub.f32 %v3256_v21, %v611_v47  ;;  %v1021_v45 = vand.u32 2147483647, %v957_v37  ;;  %v1083_v10 = vsub.f32 1.0, %v1019_v50  ;;  %v1378_v24 = vsub.f32 %v3272_v27, %v611_v47 }
 0x232   : > { %v691_v58 = vsub.f32 %v3259_v22, %v612_v36  ;;  %v753_v52 = vand.u32 2147483647, %v689_v4  ;;  %v1086_v23 = vsub.f32 1.0, %v1022_v6  ;;  %v1148_v62 = vmax.f32 %v1084_v39, 0.0 }
 0x233   : > { %v690_v14 = vsub.f32 %v3256_v21, %v612_v36  ;;  %v752_v29 = vand.u32 2147483647, %v688_v41  ;;  %v1085_v7 = vsub.f32 1.0, %v1021_v45  ;;  %v1147_v33 = vmax.f32 %v1083_v10, 0.0 }
 0x234   : > { %v755_v54 = vand.u32 2147483647, %v691_v58  ;;  %v817_v8 = vsub.f32 1.0, %v753_v52  ;;  %v1150_v56 = vmax.f32 %v1086_v23, 0.0  ;;  %v1380_v57 = vsub.f32 %v3272_v27, %v612_v36  ;;  %v1992_v58 = vld [vmem:[%s3214_s10] sm:$0x3] }
 0x235   : > { %v754_v11 = vand.u32 2147483647, %v690_v14  ;;  %v816_v15 = vsub.f32 1.0, %v752_v29  ;;  %v1149_v40 = vmax.f32 %v1085_v7, 0.0  ;;  %v1442_v43 = vand.u32 2147483647, %v1378_v24 }
 0x236   : > { %v819_v44 = vsub.f32 1.0, %v755_v54  ;;  %v881_v61 = vmax.f32 %v817_v8, 0.0  ;;  %v1444_v22 = vand.u32 2147483647, %v1380_v57  ;;  %v1709_v20 = vand.u32 2147483647, %v1645_v19 }
 0x237   : > { %v818_v25 = vsub.f32 1.0, %v754_v11  ;;  %v880_v1 = vmax.f32 %v816_v15, 0.0  ;;  %v1506_v31 = vsub.f32 1.0, %v1442_v43  ;;  %v1711_v21 = vand.u32 2147483647, %v1647_v55 }
 0x238   : > { %v883_v16 = vmax.f32 %v819_v44, 0.0  ;;  %v1213_v5 = vmul.f32 %v1148_v62, %v881_v61  ;;  %v1508_v18 = vsub.f32 1.0, %v1444_v22  ;;  %v1773_v51 = vsub.f32 1.0, %v1709_v20 }
 0x239   : > { %v882_v53 = vmax.f32 %v818_v25, 0.0  ;;  %v1212_v60 = vmul.f32 %v1147_v33, %v880_v1  ;;  %v1570_v63 = vmax.f32 %v1506_v31, 0.0  ;;  %v1775_v27 = vsub.f32 1.0, %v1711_v21  ;;  %v613_v33 = vld [vmem:[%s354_s3] sm:$0xff]  ;;  %s2663_s3 = scalar_lea.vmem %s2662_s26, 256 }
 0x23a   : > { %v1215_v9 = vmul.f32 %v1150_v56, %v883_v16  ;;  %v1572_v32 = vmax.f32 %v1508_v18, 0.0  ;;  %v1837_v17 = vmax.f32 %v1773_v51, 0.0  ;;  %v1377_v42 = vsub.f32 %v3269_v26, %v611_v47  ;;  %p2665_p3 = scmp.lt.s32.totalorder %s2663_s3, %s2657_s25 }
 0x23b   : > { %v1214_v59 = vmul.f32 %v1149_v40, %v882_v53  ;;  %v1839_v30 = vmax.f32 %v1775_v27, 0.0  ;;  %v1379_v13 = vsub.f32 %v3269_v26, %v612_v36  ;;  %v1646_v19 = vsub.f32 %v3275_v28, %v3927_v46 }
 0x23c   : > { %v2307_v35 = vpack.c.bf16 %v1215_v9, %v1213_v5  ;;  %v1903_v0 = vmul.f32 %v1837_v17, %v1570_v63  ;;  %v1441_v12 = vand.u32 2147483647, %v1377_v42  ;;  %v1708_v49 = vand.u32 2147483647, %v1644_v38  ;;  %p2666_p13 = por %p2665_p3, %p2664_p2 }
 0x23d   : > { %v2309_v37 = vpack.c.bf16 %v1214_v59, %v1212_v60  ;;  %v1905_v50 = vmul.f32 %v1839_v30, %v1572_v32  ;;  %v1443_v55 = vand.u32 2147483647, %v1379_v13  ;;  %v1710_v4 = vand.u32 2147483647, %v1646_v19 }
 0x23e   : > { %2308 = vmatprep.subr.bf16.mxu0 %v2307_v35  ;;  %v1505_v6 = vsub.f32 1.0, %v1441_v12  ;;  %v1772_v39 = vsub.f32 1.0, %v1708_v49  ;;  %2505 = vrcp.f32 %v1992_v58  ;;  %p2667_p5 = pnand %p2666_p13, %p2660_p0 }
 0x23f   : > { %2310 = vmatpush1.bf16.msra.mxu0 %v2309_v37  ;;  %v2371_v47 = vpack.c.bf16 %v1905_v50, %v1903_v0  ;;  %v1507_v41 = vsub.f32 1.0, %v1443_v55  ;;  %v1774_v45 = vsub.f32 1.0, %v1710_v4 }
 0x240   : > { %v1569_v26 = vmax.f32 %v1505_v6, 0.0  ;;  %v1836_v36 = vmax.f32 %v1772_v39, 0.0 }
 0x241   : > { %2372 = vmatprep.subr.bf16.mxu1 %v2371_v47  ;;  %v1571_v28 = vmax.f32 %v1507_v41, 0.0  ;;  %v1838_v46 = vmax.f32 %v1774_v45, 0.0 }
 0x242   : > { %v1902_v10 = vmul.f32 %v1836_v36, %v1569_v26  ;;  %1284 = vmatmul.mubr.f32.vlgmr.msra.gmra.mrb[0].mxu0 %v3912_v48  ;;  %v614_v48 = vmul.f32 %v613_v33, %v613_v33 }
 0x243   : > { %v1904_v38 = vmul.f32 %v1838_v46, %v1571_v28 }
 0x245   : > { %v2373_v24 = vpack.c.bf16 %v1904_v38, %v1902_v10 }
 0x247   : > { %2374 = vmatpush1.bf16.msra.mxu1 %v2373_v24 }
 0x248   : > { %v2506_v7 = vpop.eup %2505 }
 0x249   : > { %v1999_v8 = vrot.slane %v2506_v7, %v3223_v2  ;;  %v2003_v56 = vrot.slane %v2506_v7, %v3226_v3 }
 0x24a   : > { %1974 = vmatmul.mubr.f32.vlgmr.msra.gmra.mrb[0].mxu1 %v3919_v34 }
 0x24b   : > { %v2004_v61 = vcombine.low %v1999_v8, %v2003_v56 }
 0x315   : > { %v1285_v52 = vpop.f32.mrb[0].mxu0 }
 0x316   : > { %v1295_v23 = vmul.f32 %v1285_v52, %v1285_v52  ;;  %v1287_v62 = vpop.f32.mrb[1].mxu0 }
 0x317   : > { %v1292_v14 = vcombine.low %v1285_v52, %v1287_v62  ;;  %v1296_v29 = vmul.f32 %v1287_v62, %v1287_v62 }
 0x319   : > { %v1299_v54 = vcombine.low %v1295_v23, %v1296_v29  ;;  %v1294_v34 = vadd.f32 %v1292_v14, %v613_v33 }
 0x31b   : > { %v1301_v40 = vadd.f32 %v1299_v54, %v614_v48 }
 0x31d   : > { %v1975_v57 = vpop.f32.mrb[0].mxu1 }
 0x31e   : > { %v1985_v11 = vmul.f32 %v1975_v57, %v1975_v57  ;;  %v1977_v15 = vpop.f32.mrb[1].mxu1 }
 0x31f   : > { %v1982_v43 = vcombine.low %v1975_v57, %v1977_v15  ;;  %v1986_v44 = vmul.f32 %v1977_v15, %v1977_v15 }
 0x321   : > { %v1984_v22 = vadd.f32 %v1982_v43, %v1294_v34  ;;  %v1989_v20 = vcombine.low %v1985_v11, %v1986_v44 }
 0x323   : > { %v1991_v25 = vadd.f32 %v1989_v20, %v1301_v40  ;;  %v2006_v2 = vmul.f32 %v2004_v61, %v1984_v22 }
 0x325   : > { %v2007_v3 = vmul.f32 %v2004_v61, %v1991_v25  ;;  %v2008_v1 = vmul.f32 %v2006_v2, %v2006_v2 }
 0x327   : > { %v2009_v31 = vsub.f32 %v2007_v3, %v2008_v1 }
 0x329   : > { %2010 = vst [vmem:[%s418_s24] sm:$0xff] %v2009_v31 }
 0x32a   : > { %2670 = shalt.err (!%p2667_p5)
}
 0x32b   : > { %s2671_s23 = scalar_lea.hbm %s3970_s21, 128  ;;  %s2675_s7 = scalar_lea.hbm %s4124_s9, 2048 }
 0x32c   : > { %p2672_p9 = scmp.ne.s32.totalorder %s3970_s21, %s2671_s23  ;;  %p2676_p10 = scmp.lt.u32.totalorder %s3970_s21, %s4124_s9 }
 0x32d   : > { %p2677_p7 = scmp.lt.u32.totalorder %s2675_s7, %s2671_s23  ;;  %p2679_p11 = scmp.lt.u32.totalorder %s2671_s23, %s3970_s21 }
 0x32e   : > { %p2673_p1 = pnand %p2672_p9, %p4125_p4 }
 0x32f   : > { %p2678_p8 = por %p2677_p7, %p2676_p10 }
 0x330   : > { %p2674_p12 = pneg %p2673_p1 }
 0x331   : > { %p2680_p6 = por %p2679_p11, %p2678_p8 }
 0x333   : > { %p2681_p0 = pnand %p2680_p6, %p2674_p12 }
 0x335   : > { %2684 = shalt.err (!%p2681_p0)
}
 0x336   : > { %2385 = dma.vmem_to_hbm [thread:$0]  (%p4125_p4), %s3972_s30, 128, %s3970_s21, %s2012_s1  }
 0x337 PF: > { %s4126_s11 = sld [smem:[#allocation24_spill]]  ;;  %s4127_s6 = sld [smem:[#allocation19_spill]] }
 0x338   : > { %s4128_s13 = sld [smem:[#allocation28_spill]] }
 0x33d   : > { %p2408_p2 = scmp.ge.s32.totalorder %s4126_s11, 2  ;;  %s2040_s14 = sand.u32 1, %s4127_s6  }
 0x33e   : > { %p4129_p3 = scmp.ne.s32.totalorder %s4128_s13, 0  ;;  %s2041_s17 = scalar_lea.sflag [#allocation4], %s2040_s14 }
 0x340   : > { %p2404_p13 = pnand %p2408_p2, %p4129_p3 }
 0x342   : > { %2750 = dma.done.wait (!%p2404_p13), %s2041_s17, 128  }
 0x343   : > { %2752 = vsyncadd (!%p2404_p13), %s2041_s17, 4294967168  ;;  %s27_s28 = sadd.s32 1, %s4126_s11   ;;  %s4130_s18 = sld [smem:[#allocation18_spill]] }
 0x344   : > { %p24_p5 = scmp.ge.s32.totalorder %s27_s28, 18   ;;  %s4131_s16 = sld [smem:[#allocation30_spill]] }
 0x345   : > { %s4132_s5 = sld [smem:[#allocation20_spill]]  ;;  %s4133_s23 = sld [smem:[#allocation29_spill]] }
 0x346   : > { %s4134_s24 = sld [smem:[#allocation23_spill]]  ;;  %s4135_s26 = sld [smem:[#allocation25_spill]] }
 0x347   : > { %s4136_s30 = sld [smem:[#allocation26_spill]]  ;;  %s4137_s19 = smov %s2763_s20 }
 0x348   : > { %s4139_s21 = smov %s2771_s22  ;;  %s4141_s25 = smov %s2791_s27 }
 0x349   :  { %26 = sbr.rel (!%p24_p5) target bundleno = 17 (0x11), region = 136 }
 0x34a   : > { %s4138_s20 = smov %s4131_s16 }
 0x34b   : > { %s4140_s22 = smov %s4132_s5 }
 0x34d   : > { %s4142_s27 = smov %s4136_s30 }
 0x350   :  { %2046 = vsyncpa [#allocation3], 1 }
 0x351   :  { %2048 = vsyncpa [#allocation3 + $0x1], 1 }
 0x352   :  { %2049 = vsyncpa [#allocation6], 1 }
 0x353   :  { %2051 = vsyncpa [#allocation6 + $0x1], 1 }
 0x354   :  { %2052 = vsyncpa [#allocation9], 1 }
 0x355   :  { %2054 = vsyncpa [#allocation9 + $0x1], 1 }
 0x356   :  { %2055 = vsyncpa [#allocation4], 1 }
 0x357   :  { %2057 = vsyncpa [#allocation4 + $0x1], 1 }

</bundles_post_ra>
